<compile_context>
chip_gen: v7x
topology: tpu7x:2x2x1
jax: 0.10.0
libtpu: 0.0.40
codegen_flags: <defaults>
</compile_context>

<pallas_src>
import jax
import jax.numpy as jnp
from jax import lax
from jax.experimental import pallas as pl
from jax.experimental.pallas import tpu as pltpu


# ---------------------------------------------------------------------------
# Single fused kernel: conv1+bn1+relu+pool1 -> conv2+... -> conv3+... -> fc1
# -> (dropout = identity in eval) -> relu -> fc2 (128-lane padded output).
# ---------------------------------------------------------------------------
def fused_forward_kernel(x_ref,
                         w1_ref, b1_ref,
                         w2_ref, b2_ref,
                         w3_ref, b3_ref,
                         fw1_ref, fb1_ref,
                         fw2_ref, fb2_ref,
                         o_ref):
    B, Cin, W = x_ref.shape

    def conv_bn_relu_pool(x2, width, w_ref, b_ref):
        # x2: (R, C) f32, rows ordered (batch, width-position), R = nb*width.
        # w_ref: (3, C, Cout) bf16 with BN scale folded in.
        # b_ref: (1, Cout) f32 folded conv-bias + BN shift.
        R, C = x2.shape
        nb = R // width
        Cout = w_ref.shape[-1]

        # Edge masks for padding=1: zero the first / last width-position of
        # every batch row-group (static unroll over nb — no integer rem).
        ridx = lax.broadcasted_iota(jnp.int32, (R, C), 0)
        first = ridx == 0
        last = ridx == width - 1
        for b in range(1, nb):
            first = jnp.logical_or(first, ridx == b * width)
            last = jnp.logical_or(last, ridx == b * width + width - 1)

        # Shifted taps via XLU sublane rotation + masked edges (no pad concat).
        x_prev = jnp.where(first, 0.0, pltpu.roll(x2, shift=1, axis=0))      # x[w-1]
        x_next = jnp.where(last, 0.0, pltpu.roll(x2, shift=R - 1, axis=0))   # x[w+1]

        # Three per-tap MXU dots: bf16 operands, f32 accumulation.
        y = jnp.dot(x_prev.astype(jnp.bfloat16), w_ref[0],
                    preferred_element_type=jnp.float32)
        y = y + jnp.dot(x2.astype(jnp.bfloat16), w_ref[1],
                        preferred_element_type=jnp.float32)
        y = y + jnp.dot(x_next.astype(jnp.bfloat16), w_ref[2],
                        preferred_element_type=jnp.float32)

        y = jnp.maximum(y + b_ref[...], 0.0)                  # BN shift + ReLU (f32)
        return jnp.max(y.reshape(R // 2, 2, Cout), axis=1)    # MaxPool1d(2) -> (R//2, Cout)

    # NCW -> channels-last rows (b*W + w, Cin) with in-kernel 2-D transposes
    # (one tiny XLU transpose per batch) — no wrapper-side transpose launch.
    rows = [x_ref[b].T for b in range(B)]                      # each (W, Cin)
    x2 = rows[0] if B == 1 else jnp.concatenate(rows, axis=0)  # (B*W, Cin) f32

    y = conv_bn_relu_pool(x2, W, w1_ref, b1_ref)               # (B*W/2,  32)
    y = conv_bn_relu_pool(y, W // 2, w2_ref, b2_ref)           # (B*W/4,  64)
    y = conv_bn_relu_pool(y, W // 4, w3_ref, b3_ref)           # (B*W/8, 128)

    # fc1 as per-width-position accumulated dots (fw1 pre-reshaped offline to
    # (W//8, 128, Hid)): keeps y in its native lane layout, no flatten merge.
    W3, C3, Hid = fw1_ref.shape
    y3 = y.reshape(B, W3, C3)
    acc = jnp.dot(y3[:, 0, :].astype(jnp.bfloat16), fw1_ref[0],
                  preferred_element_type=jnp.float32)
    for p in range(1, W3):
        acc = acc + jnp.dot(y3[:, p, :].astype(jnp.bfloat16), fw1_ref[p],
                            preferred_element_type=jnp.float32)

    # TODO(synk): training-mode Dropout (random mask + 1/(1-p) scale) not
    # implemented; this matches eval/inference semantics where it is identity.
    h = jnp.maximum(acc + fb1_ref[...], 0.0)

    out = jnp.dot(h.astype(jnp.bfloat16), fw2_ref[...],
                  preferred_element_type=jnp.float32) + fb2_ref[...]
    o_ref[...] = out.astype(o_ref.dtype)                       # (B, 128) lane-dense store


# ---------------------------------------------------------------------------
# One-time parameter preparation (outside the hot path): fold BN into conv
# weights/bias, lay conv weights out per-tap, pre-reshape/permute FC weights,
# pad fc2 to 128 output lanes, and cast every dot operand to bf16.
# ---------------------------------------------------------------------------
def prepare_params(params, eps=1e-5):
    (c1_w, c1_b, g1, be1, m1, v1,
     c2_w, c2_b, g2, be2, m2, v2,
     c3_w, c3_b, g3, be3, m3, v3,
     fc1_w, fc1_b, fc2_w, fc2_b) = params

    def fold_conv_bn(cw, cb, g, be, m, v):
        cout, _cin, _k = cw.shape
        scale = g / jnp.sqrt(v + eps)                                   # (Cout,)
        # (Cout, Cin, 3) -> (3, Cin, Cout) with the BN scale folded in.
        w = (jnp.transpose(cw, (2, 1, 0)) * scale[None, None, :]).astype(jnp.bfloat16)
        bias = ((cb - m) * scale + be).reshape(1, cout).astype(jnp.float32)
        return w, bias

    w1, b1 = fold_conv_bn(c1_w, c1_b, g1, be1, m1, v1)
    w2, b2 = fold_conv_bn(c2_w, c2_b, g2, be2, m2, v2)
    w3, b3 = fold_conv_bn(c3_w, c3_b, g3, be3, m3, v3)

    hid, feat = fc1_w.shape
    c3 = c3_w.shape[0]                       # 128
    w3_len = feat // c3                      # input_width // 8
    # PyTorch flattens (B, C, W3) with index c*W3 + w; the kernel consumes one
    # (B, 128) slab per width-position:  fw1[w, c, h] == fc1_w[h, c*W3 + w].
    fw1 = jnp.transpose(fc1_w.reshape(hid, c3, w3_len), (2, 1, 0)).astype(jnp.bfloat16)
    fb1 = fc1_b.reshape(1, hid).astype(jnp.float32)

    dout = fc2_w.shape[0]
    dpad = ((dout + 127) // 128) * 128       # lane-dense final store
    fw2 = jnp.zeros((hid, dpad), jnp.float32).at[:, :dout].set(fc2_w.T).astype(jnp.bfloat16)
    fb2 = jnp.zeros((1, dpad), jnp.float32).at[:, :dout].set(fc2_b.reshape(1, dout))

    return (w1, b1, w2, b2, w3, b3, fw1, fb1, fw2, fb2)


# ---------------------------------------------------------------------------
# Forward wrapper: PyTorch NCW input in, (B, output_dim) out.  One launch.
# ---------------------------------------------------------------------------
def conv1d_3x_3_forward(x_ncw, prepared, *, dout):
    w1, b1, w2, b2, w3, b3, fw1, fb1, fw2, fb2 = prepared
    B, _, W = x_ncw.shape
    assert W % 8 == 0, "input_width must be divisible by 8 (three MaxPool1d(2) stages)"
    dpad = fw2.shape[1]
    out_full = pl.pallas_call(
        fused_forward_kernel,
        out_shape=jax.ShapeDtypeStruct((B, dpad), jnp.float32),
    )(x_ncw.astype(jnp.float32), w1, b1, w2, b2, w3, b3, fw1, fb1, fw2, fb2)
    return out_full[:, :dout]


# ---------------------------------------------------------------------------
# Pure-JAX reference (mirrors the PyTorch module in eval mode, f32 HIGHEST).
# ---------------------------------------------------------------------------
def reference_forward(x, params, eps=1e-5):
    (c1_w, c1_b, g1, be1, m1, v1,
     c2_w, c2_b, g2, be2, m2, v2,
     c3_w, c3_b, g3, be3, m3, v3,
     fc1_w, fc1_b, fc2_w, fc2_b) = params
    hp = lax.Precision.HIGHEST

    def block(y, cw, cb, g, be, m, v):
        B, _, W = y.shape
        yp = jnp.pad(y, ((0, 0), (0, 0), (1, 1)))
        conv = sum(jnp.einsum('bcw,oc->bow', yp[:, :, k:k + W], cw[:, :, k],
                              precision=hp)
                   for k in range(3)) + cb[None, :, None]
        bn = (conv - m[None, :, None]) / jnp.sqrt(v + eps)[None, :, None] \
            * g[None, :, None] + be[None, :, None]
        r = jnp.maximum(bn, 0.0)
        C = r.shape[1]
        return jnp.max(r.reshape(B, C, W // 2, 2), axis=-1)

    y = block(x, c1_w, c1_b, g1, be1, m1, v1)
    y = block(y, c2_w, c2_b, g2, be2, m2, v2)
    y = block(y, c3_w, c3_b, g3, be3, m3, v3)
    y = y.reshape(y.shape[0], -1)
    y = jnp.maximum(jnp.dot(y, fc1_w.T, precision=hp) + fc1_b, 0.0)  # Dropout = identity
    return jnp.dot(y, fc2_w.T, precision=hp) + fc2_b


if __name__ == "__main__":
    # Module config: input_width=16, input_channels=4, output_dim=8
    B, Cin, W, Dout = 2, 4, 16, 8
    Hid = 128
    F = 128 * (W // 8)

    key = jax.random.PRNGKey(0)
    ks = jax.random.split(key, 24)

    def conv_p(i, cout, cin):
        return (jax.random.normal(ks[i], (cout, cin, 3), jnp.float32) * 0.10,
                jax.random.normal(ks[i + 1], (cout,), jnp.float32) * 0.10)

    def bn_p(i, c):
        g = 1.0 + 0.1 * jax.random.normal(ks[i], (c,), jnp.float32)
        be = 0.1 * jax.random.normal(ks[i + 1], (c,), jnp.float32)
        m = 0.1 * jax.random.normal(ks[i + 2], (c,), jnp.float32)
        v = jax.random.uniform(ks[i + 3], (c,), jnp.float32, 0.5, 1.5)
        return g, be, m, v

    c1_w, c1_b = conv_p(0, 32, Cin)
    c2_w, c2_b = conv_p(2, 64, 32)
    c3_w, c3_b = conv_p(4, 128, 64)
    g1, be1, m1, v1 = bn_p(6, 32)
    g2, be2, m2, v2 = bn_p(10, 64)
    g3, be3, m3, v3 = bn_p(14, 128)
    fc1_w = jax.random.normal(ks[18], (Hid, F), jnp.float32) * 0.05
    fc1_b = jax.random.normal(ks[19], (Hid,), jnp.float32) * 0.05
    fc2_w = jax.random.normal(ks[20], (Dout, Hid), jnp.float32) * 0.05
    fc2_b = jax.random.normal(ks[21], (Dout,), jnp.float32) * 0.05
    x = jax.random.normal(ks[22], (B, Cin, W), jnp.float32)

    params = (c1_w, c1_b, g1, be1, m1, v1,
              c2_w, c2_b, g2, be2, m2, v2,
              c3_w, c3_b, g3, be3, m3, v3,
              fc1_w, fc1_b, fc2_w, fc2_b)

    prepared = prepare_params(params)
    fwd = jax.jit(conv1d_3x_3_forward, static_argnames=("dout",))
    out = jax.block_until_ready(fwd(x, prepared, dout=Dout))
    ref = jax.block_until_ready(reference_forward(x, params))

    assert out.shape == (B, Dout)
    # bf16 MXU operands with f32 accumulation through 5 matmul stages.
    assert jnp.allclose(out, ref, rtol=5e-2, atol=1e-2), (
        f"mismatch vs reference: max abs err = {jnp.max(jnp.abs(out - ref))}")
    print("KERNEL_OK")
</pallas_src>

<mosaic_0001>
module attributes {stable_mosaic.version = 11 : i64} {
  func.func @fused_forward_kernel(%arg0: memref<2x4x16xf32, #tpu.memory_space<vmem>>, %arg1: memref<3x4x32xbf16, #tpu.memory_space<vmem>>, %arg2: memref<1x32xf32, #tpu.memory_space<vmem>>, %arg3: memref<3x32x64xbf16, #tpu.memory_space<vmem>>, %arg4: memref<1x64xf32, #tpu.memory_space<vmem>>, %arg5: memref<3x64x128xbf16, #tpu.memory_space<vmem>>, %arg6: memref<1x128xf32, #tpu.memory_space<vmem>>, %arg7: memref<2x128x128xbf16, #tpu.memory_space<vmem>>, %arg8: memref<1x128xf32, #tpu.memory_space<vmem>>, %arg9: memref<128x128xbf16, #tpu.memory_space<vmem>>, %arg10: memref<1x128xf32, #tpu.memory_space<vmem>>, %arg11: memref<2x128xf32, #tpu.memory_space<vmem>>) attributes {dimension_semantics = [], scalar_prefetch = 0 : i64, scratch_operands = 0 : i64, tpu.core_type = #tpu.core_type<tc>} {
    %c0 = arith.constant 0 : index
    %c0_0 = arith.constant 0 : index
    %c0_1 = arith.constant 0 : index
    %0 = vector.load %arg0[%c0, %c0_0, %c0_1] : memref<2x4x16xf32, #tpu.memory_space<vmem>>, vector<1x4x16xf32>
    %1 = vector.shape_cast %0 : vector<1x4x16xf32> to vector<4x16xf32>
    %2 = tpu.transpose %1, [1, 0] : vector<4x16xf32> -> vector<16x4xf32>
    %c1 = arith.constant 1 : index
    %c0_2 = arith.constant 0 : index
    %c0_3 = arith.constant 0 : index
    %3 = vector.load %arg0[%c1, %c0_2, %c0_3] : memref<2x4x16xf32, #tpu.memory_space<vmem>>, vector<1x4x16xf32>
    %4 = vector.shape_cast %3 : vector<1x4x16xf32> to vector<4x16xf32>
    %5 = tpu.transpose %4, [1, 0] : vector<4x16xf32> -> vector<16x4xf32>
    %6 = tpu.concatenate %2, %5 in 0 : vector<16x4xf32>, vector<16x4xf32> -> vector<32x4xf32>
    %7 = tpu.iota {dimensions = array<i32: 0>} : vector<32x4xi32>
    %c0_i32 = arith.constant 0 : i32
    %8 = vector.broadcast %c0_i32 : i32 to vector<32x4xi32>
    %9 = arith.cmpi eq, %7, %8 : vector<32x4xi32>
    %c15_i32 = arith.constant 15 : i32
    %10 = vector.broadcast %c15_i32 : i32 to vector<32x4xi32>
    %11 = arith.cmpi eq, %7, %10 : vector<32x4xi32>
    %c16_i32 = arith.constant 16 : i32
    %12 = vector.broadcast %c16_i32 : i32 to vector<32x4xi32>
    %13 = arith.cmpi eq, %7, %12 : vector<32x4xi32>
    %14 = arith.ori %9, %13 : vector<32x4xi1>
    %c31_i32 = arith.constant 31 : i32
    %15 = vector.broadcast %c31_i32 : i32 to vector<32x4xi32>
    %16 = arith.cmpi eq, %7, %15 : vector<32x4xi32>
    %17 = arith.ori %11, %16 : vector<32x4xi1>
    %c1_i32 = arith.constant 1 : i32
    %18 = tpu.dynamic_rotate %6 by %c1_i32 dim 0 : vector<32x4xf32>, i32 -> vector<32x4xf32>
    %cst = arith.constant 0.000000e+00 : f32
    %19 = vector.broadcast %cst : f32 to vector<32x4xf32>
    %20 = arith.select %14, %19, %18 : vector<32x4xi1>, vector<32x4xf32>
    %c31_i32_4 = arith.constant 31 : i32
    %21 = tpu.dynamic_rotate %6 by %c31_i32_4 dim 0 : vector<32x4xf32>, i32 -> vector<32x4xf32>
    %cst_5 = arith.constant 0.000000e+00 : f32
    %22 = vector.broadcast %cst_5 : f32 to vector<32x4xf32>
    %23 = arith.select %17, %22, %21 : vector<32x4xi1>, vector<32x4xf32>
    %24 = arith.truncf %20 : vector<32x4xf32> to vector<32x4xbf16>
    %c0_6 = arith.constant 0 : index
    %c0_7 = arith.constant 0 : index
    %c0_8 = arith.constant 0 : index
    %25 = vector.load %arg1[%c0_6, %c0_7, %c0_8] : memref<3x4x32xbf16, #tpu.memory_space<vmem>>, vector<1x4x32xbf16>
    %26 = vector.shape_cast %25 : vector<1x4x32xbf16> to vector<4x32xbf16>
    %cst_9 = arith.constant dense<0.000000e+00> : vector<32x32xf32>
    %27 = tpu.matmul %24, %26, %cst_9 {dimension_numbers = #tpu.dot_dimension_numbers<[1], [0], [0], [1], [0, 0, 1, 1], [], []>} : vector<32x4xbf16>, vector<4x32xbf16>, vector<32x32xf32> -> vector<32x32xf32>
    %28 = arith.truncf %6 : vector<32x4xf32> to vector<32x4xbf16>
    %c1_10 = arith.constant 1 : index
    %c0_11 = arith.constant 0 : index
    %c0_12 = arith.constant 0 : index
    %29 = vector.load %arg1[%c1_10, %c0_11, %c0_12] : memref<3x4x32xbf16, #tpu.memory_space<vmem>>, vector<1x4x32xbf16>
    %30 = vector.shape_cast %29 : vector<1x4x32xbf16> to vector<4x32xbf16>
    %cst_13 = arith.constant dense<0.000000e+00> : vector<32x32xf32>
    %31 = tpu.matmul %28, %30, %cst_13 {dimension_numbers = #tpu.dot_dimension_numbers<[1], [0], [0], [1], [0, 0, 1, 1], [], []>} : vector<32x4xbf16>, vector<4x32xbf16>, vector<32x32xf32> -> vector<32x32xf32>
    %32 = arith.addf %27, %31 : vector<32x32xf32>
    %33 = arith.truncf %23 : vector<32x4xf32> to vector<32x4xbf16>
    %c2 = arith.constant 2 : index
    %c0_14 = arith.constant 0 : index
    %c0_15 = arith.constant 0 : index
    %34 = vector.load %arg1[%c2, %c0_14, %c0_15] : memref<3x4x32xbf16, #tpu.memory_space<vmem>>, vector<1x4x32xbf16>
    %35 = vector.shape_cast %34 : vector<1x4x32xbf16> to vector<4x32xbf16>
    %cst_16 = arith.constant dense<0.000000e+00> : vector<32x32xf32>
    %36 = tpu.matmul %33, %35, %cst_16 {dimension_numbers = #tpu.dot_dimension_numbers<[1], [0], [0], [1], [0, 0, 1, 1], [], []>} : vector<32x4xbf16>, vector<4x32xbf16>, vector<32x32xf32> -> vector<32x32xf32>
    %37 = arith.addf %32, %36 : vector<32x32xf32>
    %c0_17 = arith.constant 0 : index
    %c0_18 = arith.constant 0 : index
    %38 = vector.load %arg2[%c0_17, %c0_18] : memref<1x32xf32, #tpu.memory_space<vmem>>, vector<1x32xf32>
    %39 = vector.broadcast %38 : vector<1x32xf32> to vector<32x32xf32>
    %40 = arith.addf %37, %39 : vector<32x32xf32>
    %cst_19 = arith.constant 0.000000e+00 : f32
    %41 = vector.broadcast %cst_19 : f32 to vector<32x32xf32>
    %42 = arith.maximumf %40, %41 : vector<32x32xf32>
    %43 = vector.shape_cast %42 : vector<32x32xf32> to vector<16x2x32xf32>
    %cst_20 = arith.constant dense<0xFF800000> : vector<16x32xf32>
    %44 = vector.multi_reduction <maximumf>, %43, %cst_20 [1] : vector<16x2x32xf32> to vector<16x32xf32>
    %45 = tpu.iota {dimensions = array<i32: 0>} : vector<16x32xi32>
    %c0_i32_21 = arith.constant 0 : i32
    %46 = vector.broadcast %c0_i32_21 : i32 to vector<16x32xi32>
    %47 = arith.cmpi eq, %45, %46 : vector<16x32xi32>
    %c7_i32 = arith.constant 7 : i32
    %48 = vector.broadcast %c7_i32 : i32 to vector<16x32xi32>
    %49 = arith.cmpi eq, %45, %48 : vector<16x32xi32>
    %c8_i32 = arith.constant 8 : i32
    %50 = vector.broadcast %c8_i32 : i32 to vector<16x32xi32>
    %51 = arith.cmpi eq, %45, %50 : vector<16x32xi32>
    %52 = arith.ori %47, %51 : vector<16x32xi1>
    %c15_i32_22 = arith.constant 15 : i32
    %53 = vector.broadcast %c15_i32_22 : i32 to vector<16x32xi32>
    %54 = arith.cmpi eq, %45, %53 : vector<16x32xi32>
    %55 = arith.ori %49, %54 : vector<16x32xi1>
    %c1_i32_23 = arith.constant 1 : i32
    %56 = tpu.dynamic_rotate %44 by %c1_i32_23 dim 0 : vector<16x32xf32>, i32 -> vector<16x32xf32>
    %cst_24 = arith.constant 0.000000e+00 : f32
    %57 = vector.broadcast %cst_24 : f32 to vector<16x32xf32>
    %58 = arith.select %52, %57, %56 : vector<16x32xi1>, vector<16x32xf32>
    %c15_i32_25 = arith.constant 15 : i32
    %59 = tpu.dynamic_rotate %44 by %c15_i32_25 dim 0 : vector<16x32xf32>, i32 -> vector<16x32xf32>
    %cst_26 = arith.constant 0.000000e+00 : f32
    %60 = vector.broadcast %cst_26 : f32 to vector<16x32xf32>
    %61 = arith.select %55, %60, %59 : vector<16x32xi1>, vector<16x32xf32>
    %62 = arith.truncf %58 : vector<16x32xf32> to vector<16x32xbf16>
    %c0_27 = arith.constant 0 : index
    %c0_28 = arith.constant 0 : index
    %c0_29 = arith.constant 0 : index
    %63 = vector.load %arg3[%c0_27, %c0_28, %c0_29] : memref<3x32x64xbf16, #tpu.memory_space<vmem>>, vector<1x32x64xbf16>
    %64 = vector.shape_cast %63 : vector<1x32x64xbf16> to vector<32x64xbf16>
    %cst_30 = arith.constant dense<0.000000e+00> : vector<16x64xf32>
    %65 = tpu.matmul %62, %64, %cst_30 {dimension_numbers = #tpu.dot_dimension_numbers<[1], [0], [0], [1], [0, 0, 1, 1], [], []>} : vector<16x32xbf16>, vector<32x64xbf16>, vector<16x64xf32> -> vector<16x64xf32>
    %66 = arith.truncf %44 : vector<16x32xf32> to vector<16x32xbf16>
    %c1_31 = arith.constant 1 : index
    %c0_32 = arith.constant 0 : index
    %c0_33 = arith.constant 0 : index
    %67 = vector.load %arg3[%c1_31, %c0_32, %c0_33] : memref<3x32x64xbf16, #tpu.memory_space<vmem>>, vector<1x32x64xbf16>
    %68 = vector.shape_cast %67 : vector<1x32x64xbf16> to vector<32x64xbf16>
    %cst_34 = arith.constant dense<0.000000e+00> : vector<16x64xf32>
    %69 = tpu.matmul %66, %68, %cst_34 {dimension_numbers = #tpu.dot_dimension_numbers<[1], [0], [0], [1], [0, 0, 1, 1], [], []>} : vector<16x32xbf16>, vector<32x64xbf16>, vector<16x64xf32> -> vector<16x64xf32>
    %70 = arith.addf %65, %69 : vector<16x64xf32>
    %71 = arith.truncf %61 : vector<16x32xf32> to vector<16x32xbf16>
    %c2_35 = arith.constant 2 : index
    %c0_36 = arith.constant 0 : index
    %c0_37 = arith.constant 0 : index
    %72 = vector.load %arg3[%c2_35, %c0_36, %c0_37] : memref<3x32x64xbf16, #tpu.memory_space<vmem>>, vector<1x32x64xbf16>
    %73 = vector.shape_cast %72 : vector<1x32x64xbf16> to vector<32x64xbf16>
    %cst_38 = arith.constant dense<0.000000e+00> : vector<16x64xf32>
    %74 = tpu.matmul %71, %73, %cst_38 {dimension_numbers = #tpu.dot_dimension_numbers<[1], [0], [0], [1], [0, 0, 1, 1], [], []>} : vector<16x32xbf16>, vector<32x64xbf16>, vector<16x64xf32> -> vector<16x64xf32>
    %75 = arith.addf %70, %74 : vector<16x64xf32>
    %c0_39 = arith.constant 0 : index
    %c0_40 = arith.constant 0 : index
    %76 = vector.load %arg4[%c0_39, %c0_40] : memref<1x64xf32, #tpu.memory_space<vmem>>, vector<1x64xf32>
    %77 = vector.broadcast %76 : vector<1x64xf32> to vector<16x64xf32>
    %78 = arith.addf %75, %77 : vector<16x64xf32>
    %cst_41 = arith.constant 0.000000e+00 : f32
    %79 = vector.broadcast %cst_41 : f32 to vector<16x64xf32>
    %80 = arith.maximumf %78, %79 : vector<16x64xf32>
    %81 = vector.shape_cast %80 : vector<16x64xf32> to vector<8x2x64xf32>
    %cst_42 = arith.constant dense<0xFF800000> : vector<8x64xf32>
    %82 = vector.multi_reduction <maximumf>, %81, %cst_42 [1] : vector<8x2x64xf32> to vector<8x64xf32>
    %83 = tpu.iota {dimensions = array<i32: 0>} : vector<8x64xi32>
    %c0_i32_43 = arith.constant 0 : i32
    %84 = vector.broadcast %c0_i32_43 : i32 to vector<8x64xi32>
    %85 = arith.cmpi eq, %83, %84 : vector<8x64xi32>
    %c3_i32 = arith.constant 3 : i32
    %86 = vector.broadcast %c3_i32 : i32 to vector<8x64xi32>
    %87 = arith.cmpi eq, %83, %86 : vector<8x64xi32>
    %c4_i32 = arith.constant 4 : i32
    %88 = vector.broadcast %c4_i32 : i32 to vector<8x64xi32>
    %89 = arith.cmpi eq, %83, %88 : vector<8x64xi32>
    %90 = arith.ori %85, %89 : vector<8x64xi1>
    %c7_i32_44 = arith.constant 7 : i32
    %91 = vector.broadcast %c7_i32_44 : i32 to vector<8x64xi32>
    %92 = arith.cmpi eq, %83, %91 : vector<8x64xi32>
    %93 = arith.ori %87, %92 : vector<8x64xi1>
    %c1_i32_45 = arith.constant 1 : i32
    %94 = tpu.dynamic_rotate %82 by %c1_i32_45 dim 0 : vector<8x64xf32>, i32 -> vector<8x64xf32>
    %cst_46 = arith.constant 0.000000e+00 : f32
    %95 = vector.broadcast %cst_46 : f32 to vector<8x64xf32>
    %96 = arith.select %90, %95, %94 : vector<8x64xi1>, vector<8x64xf32>
    %c7_i32_47 = arith.constant 7 : i32
    %97 = tpu.dynamic_rotate %82 by %c7_i32_47 dim 0 : vector<8x64xf32>, i32 -> vector<8x64xf32>
    %cst_48 = arith.constant 0.000000e+00 : f32
    %98 = vector.broadcast %cst_48 : f32 to vector<8x64xf32>
    %99 = arith.select %93, %98, %97 : vector<8x64xi1>, vector<8x64xf32>
    %100 = arith.truncf %96 : vector<8x64xf32> to vector<8x64xbf16>
    %c0_49 = arith.constant 0 : index
    %c0_50 = arith.constant 0 : index
    %c0_51 = arith.constant 0 : index
    %101 = vector.load %arg5[%c0_49, %c0_50, %c0_51] : memref<3x64x128xbf16, #tpu.memory_space<vmem>>, vector<1x64x128xbf16>
    %102 = vector.shape_cast %101 : vector<1x64x128xbf16> to vector<64x128xbf16>
    %cst_52 = arith.constant dense<0.000000e+00> : vector<8x128xf32>
    %103 = tpu.matmul %100, %102, %cst_52 {dimension_numbers = #tpu.dot_dimension_numbers<[1], [0], [0], [1], [0, 0, 1, 1], [], []>} : vector<8x64xbf16>, vector<64x128xbf16>, vector<8x128xf32> -> vector<8x128xf32>
    %104 = arith.truncf %82 : vector<8x64xf32> to vector<8x64xbf16>
    %c1_53 = arith.constant 1 : index
    %c0_54 = arith.constant 0 : index
    %c0_55 = arith.constant 0 : index
    %105 = vector.load %arg5[%c1_53, %c0_54, %c0_55] : memref<3x64x128xbf16, #tpu.memory_space<vmem>>, vector<1x64x128xbf16>
    %106 = vector.shape_cast %105 : vector<1x64x128xbf16> to vector<64x128xbf16>
    %cst_56 = arith.constant dense<0.000000e+00> : vector<8x128xf32>
    %107 = tpu.matmul %104, %106, %cst_56 {dimension_numbers = #tpu.dot_dimension_numbers<[1], [0], [0], [1], [0, 0, 1, 1], [], []>} : vector<8x64xbf16>, vector<64x128xbf16>, vector<8x128xf32> -> vector<8x128xf32>
    %108 = arith.addf %103, %107 : vector<8x128xf32>
    %109 = arith.truncf %99 : vector<8x64xf32> to vector<8x64xbf16>
    %c2_57 = arith.constant 2 : index
    %c0_58 = arith.constant 0 : index
    %c0_59 = arith.constant 0 : index
    %110 = vector.load %arg5[%c2_57, %c0_58, %c0_59] : memref<3x64x128xbf16, #tpu.memory_space<vmem>>, vector<1x64x128xbf16>
    %111 = vector.shape_cast %110 : vector<1x64x128xbf16> to vector<64x128xbf16>
    %cst_60 = arith.constant dense<0.000000e+00> : vector<8x128xf32>
    %112 = tpu.matmul %109, %111, %cst_60 {dimension_numbers = #tpu.dot_dimension_numbers<[1], [0], [0], [1], [0, 0, 1, 1], [], []>} : vector<8x64xbf16>, vector<64x128xbf16>, vector<8x128xf32> -> vector<8x128xf32>
    %113 = arith.addf %108, %112 : vector<8x128xf32>
    %c0_61 = arith.constant 0 : index
    %c0_62 = arith.constant 0 : index
    %114 = vector.load %arg6[%c0_61, %c0_62] : memref<1x128xf32, #tpu.memory_space<vmem>>, vector<1x128xf32>
    %115 = vector.broadcast %114 : vector<1x128xf32> to vector<8x128xf32>
    %116 = arith.addf %113, %115 : vector<8x128xf32>
    %cst_63 = arith.constant 0.000000e+00 : f32
    %117 = vector.broadcast %cst_63 : f32 to vector<8x128xf32>
    %118 = arith.maximumf %116, %117 : vector<8x128xf32>
    %119 = vector.shape_cast %118 : vector<8x128xf32> to vector<4x2x128xf32>
    %cst_64 = arith.constant dense<0xFF800000> : vector<4x128xf32>
    %120 = vector.multi_reduction <maximumf>, %119, %cst_64 [1] : vector<4x2x128xf32> to vector<4x128xf32>
    %121 = vector.shape_cast %120 : vector<4x128xf32> to vector<2x2x128xf32>
    %122 = vector.extract_strided_slice %121 {offsets = [0, 0, 0], sizes = [2, 1, 128], strides = [1, 1, 1]} : vector<2x2x128xf32> to vector<2x1x128xf32>
    %123 = vector.shape_cast %122 : vector<2x1x128xf32> to vector<2x128xf32>
    %124 = arith.truncf %123 : vector<2x128xf32> to vector<2x128xbf16>
    %c0_65 = arith.constant 0 : index
    %c0_66 = arith.constant 0 : index
    %c0_67 = arith.constant 0 : index
    %125 = vector.load %arg7[%c0_65, %c0_66, %c0_67] : memref<2x128x128xbf16, #tpu.memory_space<vmem>>, vector<1x128x128xbf16>
    %126 = vector.shape_cast %125 : vector<1x128x128xbf16> to vector<128x128xbf16>
    %cst_68 = arith.constant dense<0.000000e+00> : vector<2x128xf32>
    %127 = tpu.matmul %124, %126, %cst_68 {dimension_numbers = #tpu.dot_dimension_numbers<[1], [0], [0], [1], [0, 0, 1, 1], [], []>} : vector<2x128xbf16>, vector<128x128xbf16>, vector<2x128xf32> -> vector<2x128xf32>
    %128 = vector.extract_strided_slice %121 {offsets = [0, 1, 0], sizes = [2, 1, 128], strides = [1, 1, 1]} : vector<2x2x128xf32> to vector<2x1x128xf32>
    %129 = vector.shape_cast %128 : vector<2x1x128xf32> to vector<2x128xf32>
    %130 = arith.truncf %129 : vector<2x128xf32> to vector<2x128xbf16>
    %c1_69 = arith.constant 1 : index
    %c0_70 = arith.constant 0 : index
    %c0_71 = arith.constant 0 : index
    %131 = vector.load %arg7[%c1_69, %c0_70, %c0_71] : memref<2x128x128xbf16, #tpu.memory_space<vmem>>, vector<1x128x128xbf16>
    %132 = vector.shape_cast %131 : vector<1x128x128xbf16> to vector<128x128xbf16>
    %cst_72 = arith.constant dense<0.000000e+00> : vector<2x128xf32>
    %133 = tpu.matmul %130, %132, %cst_72 {dimension_numbers = #tpu.dot_dimension_numbers<[1], [0], [0], [1], [0, 0, 1, 1], [], []>} : vector<2x128xbf16>, vector<128x128xbf16>, vector<2x128xf32> -> vector<2x128xf32>
    %134 = arith.addf %127, %133 : vector<2x128xf32>
    %c0_73 = arith.constant 0 : index
    %c0_74 = arith.constant 0 : index
    %135 = vector.load %arg8[%c0_73, %c0_74] : memref<1x128xf32, #tpu.memory_space<vmem>>, vector<1x128xf32>
    %136 = vector.broadcast %135 : vector<1x128xf32> to vector<2x128xf32>
    %137 = arith.addf %134, %136 : vector<2x128xf32>
    %cst_75 = arith.constant 0.000000e+00 : f32
    %138 = vector.broadcast %cst_75 : f32 to vector<2x128xf32>
    %139 = arith.maximumf %137, %138 : vector<2x128xf32>
    %140 = arith.truncf %139 : vector<2x128xf32> to vector<2x128xbf16>
    %c0_76 = arith.constant 0 : index
    %c0_77 = arith.constant 0 : index
    %141 = vector.load %arg9[%c0_76, %c0_77] : memref<128x128xbf16, #tpu.memory_space<vmem>>, vector<128x128xbf16>
    %cst_78 = arith.constant dense<0.000000e+00> : vector<2x128xf32>
    %142 = tpu.matmul %140, %141, %cst_78 {dimension_numbers = #tpu.dot_dimension_numbers<[1], [0], [0], [1], [0, 0, 1, 1], [], []>} : vector<2x128xbf16>, vector<128x128xbf16>, vector<2x128xf32> -> vector<2x128xf32>
    %c0_79 = arith.constant 0 : index
    %c0_80 = arith.constant 0 : index
    %143 = vector.load %arg10[%c0_79, %c0_80] : memref<1x128xf32, #tpu.memory_space<vmem>>, vector<1x128xf32>
    %144 = vector.broadcast %143 : vector<1x128xf32> to vector<2x128xf32>
    %145 = arith.addf %142, %144 : vector<2x128xf32>
    %c0_81 = arith.constant 0 : index
    %c0_82 = arith.constant 0 : index
    %146 = vector.load %arg11[%c0_81, %c0_82] : memref<2x128xf32, #tpu.memory_space<vmem>>, vector<2x128xf32>
    tpu.vector_store %arg11[%c0_81, %c0_82], %145 {strides = array<i32>} : memref<2x128xf32, #tpu.memory_space<vmem>>, vector<2x128xf32>,
    return
  }
}

</mosaic_0001>

<bundles_post_ra>
// kernel: conv1d_3x_3_forward.1
= control target key start
LH: loop header
LB: loop body
LE: loop exit
PB: predicated region body
PF: predicated region fallthrough
CT: control target
= control target key end

     0   :  { %16 = vsyncpa [#allocation3], 0  ;;  %s2725_s0 = inlined_call_operand.hbm [shape: f32[2,4,16], index: 0, kind: input, shape index: {}]   ;;  %s2726_s1 = inlined_call_operand.hbm [shape: bf16[3,4,32], index: 1, kind: input, shape index: {}]   ;;  %s2727_s2 = inlined_call_operand.vmem [shape: f32[1,32], index: 2, kind: input, shape index: {}]   ;;  %s2728_s3 = inlined_call_operand.hbm [shape: bf16[3,32,64], index: 3, kind: input, shape index: {}]   ;;  %s2729_s4 = inlined_call_operand.vmem [shape: f32[1,64], index: 4, kind: input, shape index: {}]   ;;  %s2730_s5 = inlined_call_operand.hbm [shape: bf16[3,64,128], index: 5, kind: input, shape index: {}]   ;;  %s2731_s6 = inlined_call_operand.vmem [shape: f32[1,128], index: 6, kind: input, shape index: {}]   ;;  %s2732_s7 = inlined_call_operand.hbm [shape: bf16[2,128,128], index: 7, kind: input, shape index: {}]   ;;  %s2733_s8 = inlined_call_operand.vmem [shape: f32[1,128], index: 8, kind: input, shape index: {}]   ;;  %s2734_s9 = inlined_call_operand.hbm [shape: bf16[128,128], index: 9, kind: input, shape index: {}]   ;;  %s2735_s10 = inlined_call_operand.vmem [shape: f32[1,128], index: 10, kind: input, shape index: {}]   ;;  %s2736_s11 = inlined_call_operand.hbm [shape: f32[2,128], index: 11, kind: output, shape index: {}]  }
   0x1   :  { %17 = vsyncpa [#allocation6], 0 }
   0x2   :  { %18 = vsyncpa [#allocation9], 0 }
   0x3   :  { %19 = vsyncpa [#allocation12], 0 }
   0x4   :  { %20 = vsyncpa [#allocation4], 0  ;;  %s2285_s17 = smov [#allocation5]   ;;  %s2121_s21 = scalar_lea.hbm %s2726_s1, 96 }
   0x5   :  { %s38_s18 = sshll.u32 %s2285_s17, 4  ;;  %p2122_p0 = scmp.ne.s32.totalorder %s2726_s1, %s2121_s21  ;;  %s39_s18 = int_to_ptr.vmem [resolvable:$true] %s38_s18 }
   0x6   :  { %p2125_p1 = scmp.lt.u32.totalorder %s2121_s21, %s2726_s1 }
   0x8   :  { %p2127_p2 = pnand %p2125_p1, %p2122_p0 }
   0xa   :  { %2130 = shalt.err (!%p2127_p2)
}
   0xb   :  { %s2131_s26 = scalar_lea.vmem %s39_s18, 96  ;;  %p2136_p4 = scmp.lt.s32.totalorder %s39_s18, %s39_s18 }
   0xc   :  { %p2132_p3 = scmp.ne.s32.totalorder %s39_s18, %s2131_s26  ;;  %p2137_p5 = scmp.lt.s32.totalorder %s2131_s26, %s2131_s26 }
   0xe   :  { %p2138_p6 = por %p2137_p5, %p2136_p4 }
  0x10   :  { %p2139_p7 = pnand %p2138_p6, %p2132_p3 }
  0x12   :  { %2142 = shalt.err (!%p2139_p7)
}
  0x13   :  { %s2286_s27 = smov 32   ;;  %s2287_s28 = smov 2  }
  0x14   :  { %44 = dma.hbm_to_vmem [thread:$0]  %s2726_s1, 96, %s39_s18, [#allocation6], %s2286_s27, %s2286_s27, %s2287_s28  }
  0x15   :  { %s2288_s12 = smov [#allocation8]   ;;  %s2289_s14 = smov [#allocation2]  }
  0x16   :  { %s66_s13 = sshll.u32 %s2288_s12, 4  ;;  %s26_s15 = sshll.u32 %s2289_s14, 4  ;;  %s67_s13 = int_to_ptr.vmem [resolvable:$true] %s66_s13  ;;  %s27_s15 = int_to_ptr.vmem [resolvable:$true] %s26_s15 }
  0x17   :  { %s2143_s19 = scalar_lea.hbm %s2730_s5, 1536 }
  0x18   :  { %p2144_p8 = scmp.ne.s32.totalorder %s2730_s5, %s2143_s19  ;;  %p2147_p9 = scmp.lt.u32.totalorder %s2143_s19, %s2730_s5 }
  0x1a   :  { %p2149_p10 = pnand %p2147_p9, %p2144_p8 }
  0x1c   :  { %2152 = shalt.err (!%p2149_p10)
}
  0x1d   :  { %s2153_s1 = scalar_lea.vmem %s67_s13, 1536  ;;  %p2158_p12 = scmp.lt.s32.totalorder %s67_s13, %s67_s13 }
  0x1e   :  { %p2154_p11 = scmp.ne.s32.totalorder %s67_s13, %s2153_s1  ;;  %p2159_p13 = scmp.lt.s32.totalorder %s2153_s1, %s2153_s1 }
  0x20   :  { %p2160_p0 = por %p2159_p13, %p2158_p12 }
  0x22   :  { %p2161_p1 = pnand %p2160_p0, %p2154_p11 }
  0x24   :  { %2164 = shalt.err (!%p2161_p1)
}
  0x25   :  { %s2290_s18 = smov 64   ;;  %s2291_s24 = smov 4  }
  0x26   :  { %72 = dma.hbm_to_vmem [thread:$0]  %s2730_s5, 1536, %s67_s13, [#allocation9], %s2290_s18, %s2290_s18, %s2291_s24  }
  0x27   :  { %s2165_s29 = scalar_lea.hbm %s2725_s0, 128 }
  0x28   :  { %p2166_p2 = scmp.ne.s32.totalorder %s2725_s0, %s2165_s29  ;;  %p2169_p3 = scmp.lt.u32.totalorder %s2165_s29, %s2725_s0 }
  0x2a   :  { %p2171_p4 = pnand %p2169_p3, %p2166_p2 }
  0x2c   :  { %2174 = shalt.err (!%p2171_p4)
}
  0x2d   :  { %s2175_s17 = scalar_lea.vmem %s27_s15, 128  ;;  %p2180_p6 = scmp.lt.s32.totalorder %s27_s15, %s27_s15 }
  0x2e   :  { %p2176_p5 = scmp.ne.s32.totalorder %s27_s15, %s2175_s17  ;;  %p2181_p7 = scmp.lt.s32.totalorder %s2175_s17, %s2175_s17 }
  0x30   :  { %p2182_p8 = por %p2181_p7, %p2180_p6 }
  0x32   :  { %p2183_p9 = pnand %p2182_p8, %p2176_p5 }
  0x34   :  { %2186 = shalt.err (!%p2183_p9)
}
  0x35   :  { %32 = dma.hbm_to_vmem [thread:$0]  %s2725_s0, 128, %s27_s15, [#allocation3], %s2290_s18, %s2290_s18, %s2291_s24  }
  0x36   :  { %s2292_s19 = smov [#allocation7]   ;;  %s2293_s21 = smov [#allocation10]  }
  0x37   :  { %s52_s20 = sshll.u32 %s2292_s19, 4  ;;  %s80_s22 = sshll.u32 %s2293_s21, 4  ;;  %s53_s20 = int_to_ptr.vmem [resolvable:$true] %s52_s20  ;;  %s81_s22 = int_to_ptr.vmem [resolvable:$true] %s80_s22 }
  0x38   :  { %s2187_s25 = scalar_lea.hbm %s2728_s3, 768 }
  0x39   :  { %p2188_p10 = scmp.ne.s32.totalorder %s2728_s3, %s2187_s25  ;;  %p2191_p11 = scmp.lt.u32.totalorder %s2187_s25, %s2728_s3 }
  0x3b   :  { %p2193_p12 = pnand %p2191_p11, %p2188_p10 }
  0x3d   :  { %2196 = shalt.err (!%p2193_p12)
}
  0x3e   :  { %s2197_s0 = scalar_lea.vmem %s53_s20, 768  ;;  %p2202_p0 = scmp.lt.s32.totalorder %s53_s20, %s53_s20 }
  0x3f   :  { %p2198_p13 = scmp.ne.s32.totalorder %s53_s20, %s2197_s0  ;;  %p2203_p1 = scmp.lt.s32.totalorder %s2197_s0, %s2197_s0 }
  0x41   :  { %p2204_p2 = por %p2203_p1, %p2202_p0 }
  0x43   :  { %p2205_p3 = pnand %p2204_p2, %p2198_p13 }
  0x45   :  { %2208 = shalt.err (!%p2205_p3)
}
  0x46   :  { %58 = dma.hbm_to_vmem [thread:$0]  %s2728_s3, 768, %s53_s20, [#allocation6], %s2290_s18, %s2290_s18, %s2291_s24  }
  0x47   :  { %s2209_s16 = scalar_lea.hbm %s2732_s7, 2048 }
  0x48   :  { %p2210_p4 = scmp.ne.s32.totalorder %s2732_s7, %s2209_s16  ;;  %p2213_p5 = scmp.lt.u32.totalorder %s2209_s16, %s2732_s7 }
  0x4a   :  { %p2215_p6 = pnand %p2213_p5, %p2210_p4 }
  0x4c   :  { %2218 = shalt.err (!%p2215_p6)
}
  0x4d   :  { %s2219_s21 = scalar_lea.vmem %s81_s22, 2048  ;;  %p2224_p8 = scmp.lt.s32.totalorder %s81_s22, %s81_s22 }
  0x4e   :  { %p2220_p7 = scmp.ne.s32.totalorder %s81_s22, %s2219_s21  ;;  %p2225_p9 = scmp.lt.s32.totalorder %s2219_s21, %s2219_s21 }
  0x50   :  { %p2226_p10 = por %p2225_p9, %p2224_p8 }
  0x52   :  { %p2227_p11 = pnand %p2226_p10, %p2220_p7 }
  0x54   :  { %2230 = shalt.err (!%p2227_p11)
}
  0x55   :  { %86 = dma.hbm_to_vmem [thread:$0]  %s2732_s7, 2048, %s81_s22, [#allocation9], %s2290_s18, %s2290_s18, %s2291_s24  }
  0x56   :  { %s2294_s23 = smov [#allocation11]   ;;  %s2231_s27 = scalar_lea.hbm %s2734_s9, 1024 }
  0x57   :  { %s94_s1 = sshll.u32 %s2294_s23, 4  ;;  %p2232_p12 = scmp.ne.s32.totalorder %s2734_s9, %s2231_s27  ;;  %s95_s1 = int_to_ptr.vmem [resolvable:$true] %s94_s1 }
  0x58   :  { %p2235_p13 = scmp.lt.u32.totalorder %s2231_s27, %s2734_s9 }
  0x5a   :  { %p2237_p0 = pnand %p2235_p13, %p2232_p12 }
  0x5c   :  { %2240 = shalt.err (!%p2237_p0)
}
  0x5d   :  { %s2241_s30 = scalar_lea.vmem %s95_s1, 1024  ;;  %p2246_p2 = scmp.lt.s32.totalorder %s95_s1, %s95_s1 }
  0x5e   :  { %p2242_p1 = scmp.ne.s32.totalorder %s95_s1, %s2241_s30  ;;  %p2247_p3 = scmp.lt.s32.totalorder %s2241_s30, %s2241_s30 }
  0x60   :  { %p2248_p4 = por %p2247_p3, %p2246_p2 }
  0x62   :  { %p2249_p5 = pnand %p2248_p4, %p2242_p1 }
  0x64   :  { %2252 = shalt.err (!%p2249_p5)
}
  0x65   :  { %100 = dma.hbm_to_vmem [thread:$0]  %s2734_s9, 1024, %s95_s1, [#allocation12], %s2290_s18, %s2290_s18, %s2291_s24  }
  0x66   :  { %2275 = dma.done.wait [#allocation3], 128  }
  0x67   :  { %2276 = vsyncadd [#allocation3], 4294967168 }
  0x68   :  { %2277 = dma.done.wait [#allocation6], 864  }
  0x69   :  { %2278 = vsyncadd [#allocation6], 4294966432 }
  0x6a   :  { %2279 = dma.done.wait [#allocation9], 3584  }
  0x6b   :  { %2280 = vsyncadd [#allocation9], 4294963712 }
  0x6c   :  { %2281 = dma.done.wait [#allocation12], 1024  }
  0x6d   :  { %2282 = vsyncadd [#allocation12], 4294966272  ;;  %v122_v0 = vld [vmem:[#allocation2] sm:$0xf]  ;;  %v156_v1 = vld [vmem:[#allocation2 + $0x4] sm:$0xf]  ;;  %v189_v6 = vlaneseq }
  0x6e   :  { %v2067_v2 = vpack.i.bf16 %v156_v1, %v122_v0  ;;  %v250_v3 = vld [vmem:[#allocation5 + $0x2] sm:$0x3]  ;;  %vm258_vm0 = vcmask 1041408   ;;  %v246_v5 = vld [vmem:[#allocation5] sm:$0x3]  ;;  %vm251_vm2 = vcmask 31744  }
  0x6f   :  { %2050 = vmatprep.subr.msk.bf16.mxu0 %vm258_vm0, %v250_v3  ;;  %v260_v4 = vsel %vm258_vm0, %v250_v3, 0  ;;  %v2449_v8 = vshrl.u32 %v189_v6, 7  ;;  %v318_v19 = vsel %vm258_vm0, %v246_v5, 0  ;;  %v372_v22 = vld [vmem:[#allocation5 + $0x4] sm:$0x3]  ;;  %v2079_v46 = vld [vmem:[#allocation7] sm:$0xff]  }
  0x70   :  { %2068 = vxpose.xlu0.b32.start.end [1/1] (short) (narrow) %v2067_v2, 16  ;;  %1905 = vmatpush3.bf16.msra.mxu0 %v260_v4  ;;  %v380_v38 = vsel %vm258_vm0, %v372_v22, 0  ;;  %v2080_v47 = vld [vmem:[#allocation7 + $0x10] sm:$0xff]   ;;  %v2295_v48 = vmov 0.0   ;;  %v2081_v49 = vld [vmem:[#allocation7 + $0x8] sm:$0xff]   ;;  %v2082_v50 = vld [vmem:[#allocation7 + $0x18] sm:$0xff]  }
  0x71   :  { %2051 = vmatprep.subr.msk.bf16.mxu0 %vm258_vm0, %v246_v5  ;;  %vm222_vm1 = vcmp.lt.s32.totalorder %v2449_v8, 1  ;;  %vm194_vm3 = vcmp.eq.s32.totalorder %v2449_v8, 0  ;;  %v192_v24 = vadd.s32 16, %v2449_v8  ;;  %v2464_v27 = vadd.s32 8, %v2449_v8  ;;  %1930 = vmatprep.subr.bf16.mxu1 %v2295_v48  ;;  %v1791_v54 = vld [vmem:[%s2727_s2] ss:$0 sm:$0xff] }
  0x72   :  { %vm235_vm4 = vcmp.lt.s32.totalorder %v2449_v8, 7  ;;  %v193_v41 = vadd.s32 24, %v2449_v8  ;;  %1931 = vmatpush3.bf16.msra.mxu1 %v2079_v46  ;;  %vm2296_vm8 = vmmov 0   ;;  %v2297_v51 = vmov 1983009808   ;;  %s2298_s5 = smov [#allocation13]  }
  0x73   :  { %vm204_vm5 = vcmp.eq.s32.totalorder %v192_v24, 16  ;;  %vm199_vm6 = vcmp.eq.s32.totalorder %v2464_v27, 15  ;;  %1932 = vmatprep.subr.bf16.mxu1 %v2295_v48  ;;  %1934 = vmatprep.mubr.msk.bf16.mxu1 %vm2296_vm8, %v2295_v48  ;;  %v456_v52 = vunpack.c.l.s4 %v2297_v51  ;;  %vm538_vm9 = vcmask 254976   ;;  %s1773_s13 = sshll.u32 %s2298_s5, 4  ;;  %s1774_s13 = int_to_ptr.vmem [resolvable:$true] %s1773_s13 }
  0x74   :  { %vm213_vm7 = vcmp.eq.s32.totalorder %v193_v41, 31  ;;  %vm675_vm10 = vcmask 1041409   ;;  %vm677_vm11 = vcmask 1042434   ;;  %vm679_vm12 = vcmask 1043459   ;;  %p2258_p7 = scmp.lt.s32.totalorder %s1774_s13, %s1774_s13 }
  0x75   :  { %v457_v53 = vunpack.c.0.s8 %v456_v52  ;;  %vm681_vm13 = vcmask 1044484   ;;  %vm683_vm14 = vcmask 1045509   ;;  %vm685_vm15 = vcmask 1046534  }
  0x76   :  { %1933 = vmatpush3.bf16.msra.mxu1 %v2081_v49 }
  0x77   :  { %1938 = vmatprep.subr.bf16.mxu1 %v2295_v48  ;;  %v2503_v57 = vsub.s32 %v457_v53, %v2449_v8 }
  0xf0   :  { %v2069_v7 = vpop.trf.xlu0 }
  0xf1   :  { %v2070_v9 = vunpack.i.l.bf16 %v2069_v7  ;;  %v2073_v13 = vunpack.i.h.bf16 %v2069_v7 }
  0xf3   :  { %v218_v16 = vrot.slane %v2070_v9, 7  ;;  %v220_v28 = vrot.slane %v2073_v13, 7  ;;  %v233_v29 = vrot.slane %v2073_v13, 1  ;;  %v231_v32 = vrot.slane %v2070_v9, 1 }
  0xf4   :  { %v2074_v10 = vpop.trf.xlu0 }
  0xf5   :  { %v2078_v11 = vunpack.i.h.bf16 %v2074_v10  ;;  %v2075_v12 = vunpack.i.l.bf16 %v2074_v10 }
  0xf7   :  { %v221_v14 = vrot.slane %v2078_v11, 7  ;;  %v219_v15 = vrot.slane %v2075_v12, 7  ;;  %v247_v17 = vpack.c.bf16 %v2075_v12, %v2070_v9  ;;  %v248_v18 = vpack.c.bf16 %v2078_v11, %v2073_v13 }
  0xf8   :  { %v232_v25 = vrot.slane %v2075_v12, 1  ;;  %v234_v40 = vrot.slane %v2078_v11, 1 }
  0xf9   :  { %1906 = vmatprep.mubr.msk.bf16.mxu0 %vm251_vm2, %v247_v17  ;;  %v225_v20 = vsel %vm222_vm1, %v218_v16, %v219_v15  ;;  %v226_v21 = vsel %vm222_vm1, %v221_v14, %v218_v16  ;;  %v224_v30 = vsel %vm222_vm1, %v219_v15, %v220_v28  ;;  %v223_v33 = vsel %vm222_vm1, %v220_v28, %v221_v14 }
  0xfa   :  { %1907 = vmatmul.mubr.msk.bf16.vlgmr.msra.gmra.mrb[0].mxu0 %vm251_vm2, %v248_v18  ;;  %v227_v23 = vsel %vm194_vm3, 0.0, %v226_v21  ;;  %v237_v31 = vsel %vm235_vm4, %v232_v25, %v233_v29  ;;  %v229_v34 = vsel %vm204_vm5, 0.0, %v224_v30  ;;  %v238_v35 = vsel %vm235_vm4, %v231_v32, %v232_v25 }
  0xfb   :  { %1911 = vmatpush3.bf16.msra.mxu0 %v318_v19  ;;  %v244_v26 = vpack.c.bf16 %v225_v20, %v227_v23  ;;  %v241_v36 = vsel %vm199_vm6, 0.0, %v237_v31  ;;  %v245_v37 = vpack.c.bf16 %v223_v33, %v229_v34  ;;  %v239_v42 = vsel %vm235_vm4, %v234_v40, %v231_v32 }
  0xfc   :  { %2052 = vmatprep.subr.msk.bf16.mxu0 %vm258_vm0, %v372_v22  ;;  %v369_v39 = vpack.c.bf16 %v241_v36, %v238_v35  ;;  %v236_v43 = vsel %vm235_vm4, %v233_v29, %v234_v40  ;;  %v243_v44 = vsel %vm213_vm7, 0.0, %v239_v42  ;;  %vm654_vm5 = vcmp.eq.s32.totalorder %v2464_v27, 8  ;;  %v2085_v27 = vld [vmem:[#allocation8 + $0x20] sm:$0xff]  }
  0xfd   :  { %1912 = vmatprep.mubr.msk.bf16.mxu0 %vm251_vm2, %v244_v26  ;;  %v370_v45 = vpack.c.bf16 %v243_v44, %v236_v43  ;;  %vm651_vm7 = vcmp.eq.s32.totalorder %v2449_v8, 7 }
 0x106   :  { %1913 = vmatmul.mubr.msk.bf16.vlgmr.msra.gmra.mrb[0].mxu0 %vm251_vm2, %v245_v37 }
 0x107   :  { %1917 = vmatpush3.bf16.msra.mxu0 %v380_v38  ;;  %1918 = vmatprep.mubr.msk.bf16.mxu0 %vm251_vm2, %v369_v39 }
 0x108   :  { %1922 = vmatprep.subr.bf16.mxu0 %v2295_v48 }
 0x112   :  { %1919 = vmatmul.mubr.msk.bf16.vlgmr.msra.gmra.mrb[0].mxu0 %vm251_vm2, %v370_v45  ;;  %vm687_vm2 = vcmask 1047559  }
 0x113   :  { %1923 = vmatpush3.bf16.msra.mxu0 %v2080_v47  ;;  %1926 = vmatprep.mubr.msk.bf16.mxu0 %vm2296_vm8, %v2295_v48 }
 0x114   :  { %1924 = vmatprep.subr.bf16.mxu0 %v2295_v48 }
 0x117   :  { %1925 = vmatpush3.bf16.msra.mxu0 %v2082_v50 }
 0x118   :  { %1946 = vmatprep.subr.bf16.mxu0 %v2295_v48 }
 0x1e5   :  { %v1920_v55 = vpop.f32.mrb[0].mxu0 }
 0x1e6   :  { %v444_v56 = vadd.f32 %v1920_v55, %v1791_v54  ;;  %v416_v58 = vpop.f32.mrb[1].mxu0 }
 0x1e7   :  { %v442_v59 = vadd.f32 %v1791_v54, %v416_v58  ;;  %v1921_v60 = vpop.f32.mrb[2].mxu0 }
 0x1e8   :  { %v448_v61 = vmax.f32 %v444_v56, 0.0  ;;  %v445_v62 = vadd.f32 %v1921_v60, %v1791_v54  ;;  %v419_v63 = vpop.f32.mrb[3].mxu0 }
 0x1e9   :  { %v446_v0 = vmax.f32 %v442_v59, 0.0  ;;  %v443_v1 = vadd.f32 %v1791_v54, %v419_v63 }
 0x1ea   :  { %v488_v2 = vcombine.high %v448_v61, %v448_v61  ;;  %v495_v3 = vrot.slane %v448_v61, %v2503_v57  ;;  %v2506_v4 = vmax.f32 %v445_v62, 0.0 }
 0x1eb   :  { %v454_v5 = vcombine.high %v446_v0, %v446_v0  ;;  %v461_v6 = vrot.slane %v446_v0, %v2503_v57  ;;  %v2509_v7 = vmax.f32 %v443_v1, 0.0 }
 0x1ec   :  { %v502_v9 = vrot.slane %v488_v2, %v2503_v57  ;;  %v503_v10 = vcombine.high %v495_v3, %v495_v3  ;;  %v595_v11 = vsel %vm538_vm9, %v495_v3, -inf  ;;  %v505_v12 = vcombine.high %v2506_v4, %v2506_v4 }
 0x1ed   :  { %v596_v13 = vrot.slane %v595_v11, 4  ;;  %v468_v14 = vrot.slane %v454_v5, %v2503_v57  ;;  %v469_v15 = vcombine.high %v461_v6, %v461_v6  ;;  %v539_v16 = vsel %vm538_vm9, %v461_v6, -inf }
 0x1ee   :  { %v504_v17 = vcombine.high %v502_v9, %v502_v9  ;;  %v602_v18 = vsel %vm538_vm9, %v503_v10, -inf  ;;  %v609_v19 = vsel %vm538_vm9, %v502_v9, -inf  ;;  %v540_v20 = vrot.slane %v539_v16, 4 }
 0x1ef   :  { %v597_v21 = vmax.f32 %v595_v11, %v596_v13  ;;  %v603_v22 = vrot.slane %v602_v18, 4  ;;  %v610_v23 = vrot.slane %v609_v19, 4  ;;  %v470_v24 = vcombine.high %v468_v14, %v468_v14 }
 0x1f0   :  { %v616_v25 = vsel %vm538_vm9, %v504_v17, -inf  ;;  %v541_v26 = vmax.f32 %v539_v16, %v540_v20  ;;  %v546_v28 = vsel %vm538_vm9, %v469_v15, -inf  ;;  %v553_v29 = vsel %vm538_vm9, %v468_v14, -inf }
 0x1f1   :  { %v598_v30 = vrot.slane %v597_v21, 2  ;;  %v604_v31 = vmax.f32 %v602_v18, %v603_v22  ;;  %v611_v32 = vmax.f32 %v609_v19, %v610_v23  ;;  %v617_v33 = vrot.slane %v616_v25, 4 }
 0x1f2   :  { %v542_v34 = vrot.slane %v541_v26, 2  ;;  %v547_v35 = vrot.slane %v546_v28, 4  ;;  %v554_v36 = vrot.slane %v553_v29, 4  ;;  %v560_v37 = vsel %vm538_vm9, %v470_v24, -inf }
 0x1f3   :  { %v599_v38 = vmax.f32 %v597_v21, %v598_v30  ;;  %v605_v39 = vrot.slane %v604_v31, 2  ;;  %v612_v40 = vrot.slane %v611_v32, 2  ;;  %v618_v41 = vmax.f32 %v616_v25, %v617_v33 }
 0x1f4   :  { %v543_v42 = vmax.f32 %v541_v26, %v542_v34  ;;  %v548_v43 = vmax.f32 %v546_v28, %v547_v35  ;;  %v555_v44 = vmax.f32 %v553_v29, %v554_v36  ;;  %v561_v45 = vrot.slane %v560_v37, 4 }
 0x1f5   :  { %v600_v46 = vrot.slane %v599_v38, 1  ;;  %v606_v47 = vmax.f32 %v604_v31, %v605_v39  ;;  %v613_v49 = vmax.f32 %v611_v32, %v612_v40  ;;  %v619_v50 = vrot.slane %v618_v41, 2 }
 0x1f6   :  { %v544_v51 = vrot.slane %v543_v42, 1  ;;  %v549_v52 = vrot.slane %v548_v43, 2  ;;  %v556_v53 = vrot.slane %v555_v44, 2  ;;  %v562_v54 = vmax.f32 %v560_v37, %v561_v45 }
 0x1f7   :  { %v601_v55 = vmax.f32 %v599_v38, %v600_v46  ;;  %v607_v56 = vrot.slane %v606_v47, 1  ;;  %v614_v58 = vrot.slane %v613_v49, 1  ;;  %v620_v59 = vmax.f32 %v618_v41, %v619_v50 }
 0x1f8   :  { %v545_v60 = vmax.f32 %v543_v42, %v544_v51  ;;  %v550_v61 = vmax.f32 %v548_v43, %v549_v52  ;;  %v557_v62 = vmax.f32 %v555_v44, %v556_v53  ;;  %v563_v63 = vrot.slane %v562_v54, 2 }
 0x1f9   :  { %v608_v0 = vmax.f32 %v606_v47, %v607_v56  ;;  %v615_v1 = vmax.f32 %v613_v49, %v614_v58  ;;  %v621_v2 = vrot.slane %v620_v59, 1  ;;  %v723_v3 = vpack.c.bf16 %v601_v55, %v601_v55 }
 0x1fa   :  { %v551_v5 = vrot.slane %v550_v61, 1  ;;  %v558_v6 = vrot.slane %v557_v62, 1  ;;  %v564_v9 = vmax.f32 %v562_v54, %v563_v63  ;;  %v715_v10 = vpack.c.bf16 %v545_v60, %v545_v60 }
 0x1fb   :  { %v622_v11 = vmax.f32 %v620_v59, %v621_v2  ;;  %v689_v13 = vsel %vm675_vm10, %v608_v0, %v601_v55  ;;  %v724_v14 = vpack.c.bf16 %v608_v0, %v608_v0  ;;  %v725_v15 = vpack.c.bf16 %v615_v1, %v615_v1 }
 0x1fc   :  { %v690_v16 = vsel %vm677_vm11, %v615_v1, %v689_v13  ;;  %v760_v17 = vunpack.c.l.b16 %v723_v3  ;;  %v552_v18 = vmax.f32 %v550_v61, %v551_v5  ;;  %v559_v19 = vmax.f32 %v557_v62, %v558_v6 }
 0x1fd   :  { %v726_v20 = vpack.c.bf16 %v622_v11, %v622_v11  ;;  %v761_v21 = vunpack.c.l.b16 %v724_v14  ;;  %v762_v22 = vunpack.c.l.b16 %v725_v15  ;;  %v565_v23 = vrot.slane %v564_v9, 1 }
 0x1fe   :  { %v676_v24 = vsel %vm675_vm10, %v552_v18, %v545_v60  ;;  %v716_v25 = vpack.c.bf16 %v552_v18, %v552_v18  ;;  %v717_v26 = vpack.c.bf16 %v559_v19, %v559_v19  ;;  %v752_v28 = vunpack.c.l.b16 %v715_v10 }
 0x1ff   :  { %v763_v29 = vunpack.c.l.b16 %v726_v20  ;;  %v775_v30 = vsel %vm675_vm10, %v761_v21, %v760_v17  ;;  %v2527_v31 = vmax.f32 %v564_v9, %v565_v23  ;;  %v2530_v32 = vsel %vm677_vm11, %v559_v19, %v676_v24 }
 0x200   :  { %v776_v33 = vsel %vm677_vm11, %v762_v22, %v775_v30  ;;  %v753_v34 = vunpack.c.l.b16 %v716_v25  ;;  %v754_v35 = vunpack.c.l.b16 %v717_v26  ;;  %v512_v36 = vrot.slane %v2506_v4, %v2503_v57 }
 0x201   :  { %v718_v37 = vpack.c.bf16 %v2527_v31, %v2527_v31  ;;  %v519_v38 = vrot.slane %v505_v12, %v2503_v57  ;;  %v691_v39 = vsel %vm679_vm12, %v622_v11, %v690_v16  ;;  %v2543_v40 = vsel %vm679_vm12, %v763_v29, %v776_v33 }
 0x202   :  { %v768_v41 = vsel %vm675_vm10, %v753_v34, %v752_v28  ;;  %v520_v42 = vcombine.high %v512_v36, %v512_v36  ;;  %v623_v43 = vsel %vm538_vm9, %v512_v36, -inf  ;;  %v471_v44 = vcombine.high %v2509_v7, %v2509_v7 }
 0x203   :  { %v2549_v45 = vunpack.c.l.b16 %v718_v37  ;;  %v2552_v46 = vsel %vm677_vm11, %v754_v35, %v768_v41  ;;  %v521_v4 = vcombine.high %v519_v38, %v519_v38  ;;  %v624_v12 = vrot.slane %v623_v43, 4 }
 0x204   :  { %v630_v47 = vsel %vm538_vm9, %v520_v42, -inf  ;;  %v637_v49 = vsel %vm538_vm9, %v519_v38, -inf  ;;  %v478_v50 = vrot.slane %v2509_v7, %v2503_v57  ;;  %v485_v51 = vrot.slane %v471_v44, %v2503_v57 }
 0x205   :  { %v625_v52 = vmax.f32 %v623_v43, %v624_v12  ;;  %v631_v53 = vrot.slane %v630_v47, 4  ;;  %v638_v54 = vrot.slane %v637_v49, 4  ;;  %v644_v55 = vsel %vm538_vm9, %v521_v4, -inf }
 0x206   :  { %v645_v56 = vrot.slane %v644_v55, 4  ;;  %v486_v58 = vcombine.high %v478_v50, %v478_v50  ;;  %v487_v59 = vcombine.high %v485_v51, %v485_v51  ;;  %v567_v60 = vsel %vm538_vm9, %v478_v50, -inf }
 0x207   :  { %v626_v61 = vrot.slane %v625_v52, 2  ;;  %v632_v62 = vmax.f32 %v630_v47, %v631_v53  ;;  %v639_v63 = vmax.f32 %v637_v49, %v638_v54  ;;  %v568_v0 = vrot.slane %v567_v60, 4 }
 0x208   :  { %v646_v1 = vmax.f32 %v644_v55, %v645_v56  ;;  %v574_v7 = vsel %vm538_vm9, %v486_v58, -inf  ;;  %v581_v2 = vsel %vm538_vm9, %v485_v51, -inf  ;;  %v588_v3 = vsel %vm538_vm9, %v487_v59, -inf }
 0x209   :  { %v627_v5 = vmax.f32 %v625_v52, %v626_v61  ;;  %v633_v6 = vrot.slane %v632_v62, 2  ;;  %v640_v9 = vrot.slane %v639_v63, 2  ;;  %v569_v10 = vmax.f32 %v567_v60, %v568_v0 }
 0x20a   :  { %v647_v11 = vrot.slane %v646_v1, 2  ;;  %v575_v13 = vrot.slane %v574_v7, 4  ;;  %v582_v14 = vrot.slane %v581_v2, 4  ;;  %v589_v15 = vrot.slane %v588_v3, 4 }
 0x20b   :  { %v628_v16 = vrot.slane %v627_v5, 1  ;;  %v634_v17 = vmax.f32 %v632_v62, %v633_v6  ;;  %v641_v18 = vmax.f32 %v639_v63, %v640_v9  ;;  %v570_v19 = vrot.slane %v569_v10, 2 }
 0x20c   :  { %v648_v20 = vmax.f32 %v646_v1, %v647_v11  ;;  %v576_v21 = vmax.f32 %v574_v7, %v575_v13  ;;  %v583_v22 = vmax.f32 %v581_v2, %v582_v14  ;;  %v590_v23 = vmax.f32 %v588_v3, %v589_v15 }
 0x20d   :  { %v629_v24 = vmax.f32 %v627_v5, %v628_v16  ;;  %v635_v25 = vrot.slane %v634_v17, 1  ;;  %v642_v26 = vrot.slane %v641_v18, 1  ;;  %v571_v28 = vmax.f32 %v569_v10, %v570_v19 }
 0x20e   :  { %v649_v29 = vrot.slane %v648_v20, 1  ;;  %v577_v30 = vrot.slane %v576_v21, 2  ;;  %v584_v33 = vrot.slane %v583_v22, 2  ;;  %v591_v34 = vrot.slane %v590_v23, 2 }
 0x20f   :  { %v636_v35 = vmax.f32 %v634_v17, %v635_v25  ;;  %v643_v36 = vmax.f32 %v641_v18, %v642_v26  ;;  %v692_v37 = vsel %vm681_vm13, %v629_v24, %v691_v39  ;;  %v727_v38 = vpack.c.bf16 %v629_v24, %v629_v24 }
 0x210   :  { %v650_v41 = vmax.f32 %v648_v20, %v649_v29  ;;  %v572_v42 = vrot.slane %v571_v28, 1  ;;  %v578_v43 = vmax.f32 %v576_v21, %v577_v30  ;;  %v585_v44 = vmax.f32 %v583_v22, %v584_v33  ;;  %v2083_v33 = vld [vmem:[#allocation7 + $0x20] sm:$0xff]  }
 0x211   :  { %v693_v4 = vsel %vm683_vm14, %v636_v35, %v692_v37  ;;  %v728_v12 = vpack.c.bf16 %v636_v35, %v636_v35  ;;  %v729_v47 = vpack.c.bf16 %v643_v36, %v643_v36  ;;  %v764_v49 = vunpack.c.l.b16 %v727_v38 }
 0x212   :  { %v694_v50 = vsel %vm685_vm15, %v643_v36, %v693_v4  ;;  %v730_v51 = vpack.c.bf16 %v650_v41, %v650_v41  ;;  %v573_v52 = vmax.f32 %v571_v28, %v572_v42  ;;  %v579_v53 = vrot.slane %v578_v43, 1  ;;  %v2086_v42 = vld [vmem:[#allocation8] sm:$0xff]   ;;  %v2089_v4 = vld [vmem:[#allocation8 + $0x30] sm:$0xff]  }
 0x213   :  { %v765_v54 = vunpack.c.l.b16 %v728_v12  ;;  %v766_v55 = vunpack.c.l.b16 %v729_v47  ;;  %v778_v39 = vsel %vm681_vm13, %v764_v49, %v2543_v40  ;;  %v586_v56 = vrot.slane %v585_v44, 1  ;;  %v2090_v12 = vld [vmem:[#allocation8 + $0x10] sm:$0xff]   ;;  %v2091_v47 = vld [vmem:[#allocation8 + $0x38] sm:$0xff]  }
 0x214   :  { %v767_v58 = vunpack.c.l.b16 %v730_v51  ;;  %v580_v59 = vmax.f32 %v578_v43, %v579_v53  ;;  %v592_v60 = vmax.f32 %v590_v23, %v591_v34  ;;  %v680_v61 = vsel %vm679_vm12, %v2527_v31, %v2530_v32  ;;  %v2087_v43 = vld [vmem:[#allocation8 + $0x28] sm:$0xff]   ;;  %v2092_v49 = vld [vmem:[#allocation8 + $0x18] sm:$0xff]  }
 0x215   :  { %v587_v62 = vmax.f32 %v585_v44, %v586_v56  ;;  %v682_v63 = vsel %vm681_vm13, %v573_v52, %v680_v61  ;;  %v719_v0 = vpack.c.bf16 %v573_v52, %v573_v52  ;;  %v770_v1 = vsel %vm679_vm12, %v2549_v45, %v2552_v46  ;;  %v2088_v44 = vld [vmem:[#allocation8 + $0x8] sm:$0xff]   ;;  %v1801_v61 = vld [vmem:[%s2729_s4] ss:$0 sm:$0xff] }
 0x216   :  { %v593_v7 = vrot.slane %v592_v60, 1  ;;  %v684_v2 = vsel %vm683_vm14, %v580_v59, %v682_v63  ;;  %v720_v40 = vpack.c.bf16 %v580_v59, %v580_v59  ;;  %v779_v3 = vsel %vm683_vm14, %v765_v54, %v778_v39 }
 0x217   :  { %v686_v5 = vsel %vm685_vm15, %v587_v62, %v684_v2  ;;  %v721_v6 = vpack.c.bf16 %v587_v62, %v587_v62  ;;  %v756_v9 = vunpack.c.l.b16 %v719_v0  ;;  %v780_v31 = vsel %vm685_vm15, %v766_v55, %v779_v3 }
 0x218   :  { %v594_v32 = vmax.f32 %v592_v60, %v593_v7  ;;  %v757_v10 = vunpack.c.l.b16 %v720_v40  ;;  %v781_v11 = vsel %vm687_vm2, %v767_v58, %v780_v31  ;;  %v695_v13 = vsel %vm687_vm2, %v650_v41, %v694_v50  ;;  %v2084_v41 = vld [vmem:[#allocation7 + $0x28] sm:$0xff]  }
 0x219   :  { %v758_v14 = vunpack.c.l.b16 %v721_v6  ;;  %v771_v45 = vsel %vm681_vm13, %v756_v9, %v770_v1  ;;  %v699_v46 = vrot.slane %v695_v13, 7  ;;  %v705_v15 = vrot.slane %v695_v13, 1 }
 0x21a   :  { %v722_v16 = vpack.c.bf16 %v594_v32, %v594_v32  ;;  %v772_v17 = vsel %vm683_vm14, %v757_v10, %v771_v45  ;;  %v688_v18 = vsel %vm687_vm2, %v594_v32, %v686_v5  ;;  %vm795_vm9 = vcmask 261120  }
 0x21b   :  { %v773_v19 = vsel %vm685_vm15, %v758_v14, %v772_v17  ;;  %v698_v20 = vrot.slane %v688_v18, 7  ;;  %v704_v21 = vrot.slane %v688_v18, 1 }
 0x21c   :  { %v759_v22 = vunpack.c.l.b16 %v722_v16 }
 0x21d   :  { %v700_v23 = vsel %vm222_vm1, %v698_v20, %v699_v46  ;;  %v701_v24 = vsel %vm222_vm1, %v699_v46, %v698_v20  ;;  %v706_v25 = vsel %vm235_vm4, %v704_v21, %v705_v15  ;;  %v707_v26 = vsel %vm235_vm4, %v705_v15, %v704_v21 }
 0x21e   :  { %v774_v28 = vsel %vm687_vm2, %v759_v22, %v773_v19  ;;  %v702_v29 = vsel %vm194_vm3, 0.0, %v701_v24  ;;  %v703_v30 = vsel %vm654_vm5, 0.0, %v700_v23  ;;  %v708_v34 = vsel %vm651_vm7, 0.0, %v706_v25 }
 0x21f   :  { %v782_v35 = vpack.c.b16 %v781_v11, %v774_v28  ;;  %v710_v36 = vpack.c.bf16 %v703_v30, %v702_v29  ;;  %v709_v37 = vsel %vm199_vm6, 0.0, %v707_v26  ;;  %vm1015_vm1 = vcmask 517120  }
 0x220   :  { %v896_v38 = vpack.c.bf16 %v709_v37, %v708_v34  ;;  %vm1073_vm4 = vcmp.eq.s32.totalorder %v2449_v8, 4 }
 0x221   :  { %1927 = vmatmul.mubr.msk.bf16.vlgmr.msra.gmra.mrb[4].mxu0 %vm795_vm9, %v782_v35  ;;  %1935 = vmatmul.mubr.msk.bf16.vlgmr.msra.gmra.mrb[0].mxu1 %vm795_vm9, %v710_v36  ;;  %vm1074_vm6 = vmor %vm194_vm3, %vm1073_vm4  ;;  %vm1072_vm3 = vcmp.eq.s32.totalorder %v2449_v8, 3  ;;  %v2099_v8 = vld [vmem:[#allocation10 + $0x8] sm:$0xff]  }
 0x222   :  { %1939 = vmatpush3.bf16.msra.mxu1 %v2083_v33  ;;  %1942 = vmatprep.mubr.msk.bf16.mxu1 %vm2296_vm8, %v2295_v48 }
 0x223   :  { %1940 = vmatprep.subr.bf16.mxu1 %v2295_v48  ;;  %1954 = vmatprep.mubr.msk.bf16.mxu0 %vm2296_vm8, %v2295_v48 }
 0x224   :  { %1947 = vmatpush3.bf16.msra.mxu0 %v2085_v27 }
 0x225   :  { %1948 = vmatprep.subr.bf16.mxu0 %v2295_v48 }
 0x226   :  { %1941 = vmatpush3.bf16.msra.mxu1 %v2084_v41 }
 0x227   :  { %1958 = vmatprep.subr.bf16.mxu1 %v2295_v48 }
 0x228   :  { %1949 = vmatpush3.bf16.msra.mxu0 %v2087_v43 }
 0x229   :  { %1943 = vmatmul.mubr.msk.bf16.vlgmr.msra.gmra.mrb[4].mxu1 %vm795_vm9, %v896_v38  ;;  %1950 = vmatprep.subr.bf16.mxu0 %v2295_v48 }
 0x22a   :  { %1966 = vmatprep.mubr.msk.bf16.mxu1 %vm2296_vm8, %v2295_v48  ;;  %1959 = vmatpush3.bf16.msra.mxu1 %v2086_v42 }
 0x22b   :  { %1960 = vmatprep.subr.bf16.mxu1 %v2295_v48 }
 0x22c   :  { %1951 = vmatpush3.bf16.msra.mxu0 %v2089_v4 }
 0x22d   :  { %1952 = vmatprep.subr.bf16.mxu0 %v2295_v48 }
 0x22e   :  { %1961 = vmatpush3.bf16.msra.mxu1 %v2088_v44 }
 0x22f   :  { %1962 = vmatprep.subr.bf16.mxu1 %v2295_v48 }
 0x230   :  { %1953 = vmatpush3.bf16.msra.mxu0 %v2091_v47 }
 0x231   :  { %1970 = vmatprep.subr.bf16.mxu0 %v2295_v48 }
 0x232   :  { %1963 = vmatpush3.bf16.msra.mxu1 %v2090_v12 }
 0x233   :  { %1964 = vmatprep.subr.bf16.mxu1 %v2295_v48 }
 0x236   :  { %1965 = vmatpush3.bf16.msra.mxu1 %v2092_v49 }
 0x237   :  { %1982 = vmatprep.subr.bf16.mxu1 %v2295_v48 }
 0x2f4   :  { %v833_v50 = vpop.f32.mrb[4].mxu0  ;;  %v889_v51 = vpop.f32.mrb[0].mxu1 }
 0x2f5   :  { %v890_v52 = vadd.f32 %v889_v51, %v833_v50  ;;  %v1928_v53 = vpop.f32.mrb[5].mxu0  ;;  %v1936_v54 = vpop.f32.mrb[1].mxu1 }
 0x2f6   :  { %v836_v55 = vpop.f32.mrb[6].mxu0  ;;  %v892_v39 = vpop.f32.mrb[2].mxu1 }
 0x2f7   :  { %v893_v56 = vadd.f32 %v892_v39, %v836_v55  ;;  %v1929_v58 = vpop.f32.mrb[7].mxu0  ;;  %v1937_v59 = vpop.f32.mrb[3].mxu1 }
 0x2fc   :  { %v951_v60 = vpop.f32.mrb[4].mxu1 }
 0x2fd   :  { %v958_v62 = vadd.f32 %v951_v60, %v890_v52  ;;  %v1944_v63 = vpop.f32.mrb[5].mxu1 }
 0x2fe   :  { %v954_v0 = vpop.f32.mrb[6].mxu1 }
 0x2ff   :  { %v967_v1 = vadd.f32 %v1801_v61, %v958_v62  ;;  %v959_v7 = vadd.f32 %v954_v0, %v893_v56  ;;  %v1945_v2 = vpop.f32.mrb[7].mxu1 }
 0x301   :  { %v969_v40 = vmax.f32 %v967_v1, 0.0  ;;  %v968_v3 = vadd.f32 %v1801_v61, %v959_v7 }
 0x303   :  { %v973_v5 = vcombine.high %v969_v40, %v969_v40  ;;  %v980_v6 = vrot.slane %v969_v40, %v2503_v57  ;;  %v970_v9 = vmax.f32 %v968_v3, 0.0 }
 0x305   :  { %v987_v31 = vrot.slane %v973_v5, %v2503_v57  ;;  %v988_v32 = vcombine.high %v980_v6, %v980_v6  ;;  %v1016_v10 = vsel %vm1015_vm1, %v980_v6, -inf  ;;  %v990_v11 = vcombine.high %v970_v9, %v970_v9 }
 0x306   :  { %v1017_v13 = vrot.slane %v1016_v10, 4  ;;  %v997_v14 = vrot.slane %v970_v9, %v2503_v57 }
 0x307   :  { %v989_v45 = vcombine.high %v987_v31, %v987_v31  ;;  %v1023_v46 = vsel %vm1015_vm1, %v988_v32, -inf  ;;  %v1030_v15 = vsel %vm1015_vm1, %v987_v31, -inf  ;;  %v1004_v16 = vrot.slane %v990_v11, %v2503_v57 }
 0x308   :  { %v1018_v17 = vmax.f32 %v1016_v10, %v1017_v13  ;;  %v1024_v18 = vrot.slane %v1023_v46, 4  ;;  %v1031_v19 = vrot.slane %v1030_v15, 4  ;;  %v1005_v20 = vcombine.high %v997_v14, %v997_v14 }
 0x309   :  { %v1037_v21 = vsel %vm1015_vm1, %v989_v45, -inf  ;;  %v1006_v22 = vcombine.high %v1004_v16, %v1004_v16  ;;  %v1044_v23 = vsel %vm1015_vm1, %v997_v14, -inf  ;;  %v1058_v24 = vsel %vm1015_vm1, %v1004_v16, -inf }
 0x30a   :  { %v1019_v25 = vrot.slane %v1018_v17, 2  ;;  %v1025_v26 = vmax.f32 %v1023_v46, %v1024_v18  ;;  %v1032_v28 = vmax.f32 %v1030_v15, %v1031_v19  ;;  %v1038_v29 = vrot.slane %v1037_v21, 4 }
 0x30b   :  { %v1045_v30 = vrot.slane %v1044_v23, 4  ;;  %v1051_v33 = vsel %vm1015_vm1, %v1005_v20, -inf  ;;  %v1059_v34 = vrot.slane %v1058_v24, 4  ;;  %v1065_v35 = vsel %vm1015_vm1, %v1006_v22, -inf }
 0x30c   :  { %v1020_v36 = vmax.f32 %v1018_v17, %v1019_v25  ;;  %v1026_v37 = vrot.slane %v1025_v26, 2  ;;  %v1033_v38 = vrot.slane %v1032_v28, 2  ;;  %v1039_v41 = vmax.f32 %v1037_v21, %v1038_v29 }
 0x30d   :  { %v1046_v27 = vmax.f32 %v1044_v23, %v1045_v30  ;;  %v1052_v42 = vrot.slane %v1051_v33, 4  ;;  %v1060_v43 = vmax.f32 %v1058_v24, %v1059_v34  ;;  %v1066_v44 = vrot.slane %v1065_v35, 4 }
 0x30e   :  { %v1021_v4 = vrot.slane %v1020_v36, 1  ;;  %v1027_v12 = vmax.f32 %v1025_v26, %v1026_v37  ;;  %v1034_v47 = vmax.f32 %v1032_v28, %v1033_v38  ;;  %v1040_v49 = vrot.slane %v1039_v41, 2 }
 0x30f   :  { %v1047_v50 = vrot.slane %v1046_v27, 2  ;;  %v1053_v51 = vmax.f32 %v1051_v33, %v1052_v42  ;;  %v1061_v52 = vrot.slane %v1060_v43, 2  ;;  %v1067_v53 = vmax.f32 %v1065_v35, %v1066_v44 }
 0x310   :  { %v1022_v54 = vmax.f32 %v1020_v36, %v1021_v4  ;;  %v1028_v55 = vrot.slane %v1027_v12, 1  ;;  %v1035_v39 = vrot.slane %v1034_v47, 1  ;;  %v1041_v56 = vmax.f32 %v1039_v41, %v1040_v49 }
 0x311   :  { %v1048_v58 = vmax.f32 %v1046_v27, %v1047_v50  ;;  %v1054_v59 = vrot.slane %v1053_v51, 2  ;;  %v1062_v60 = vmax.f32 %v1060_v43, %v1061_v52  ;;  %v1068_v61 = vrot.slane %v1067_v53, 2  ;;  %v2094_v50 = vld [vmem:[#allocation8 + $0x48] sm:$0xff]  }
 0x312   :  { %v1029_v62 = vmax.f32 %v1027_v12, %v1028_v55  ;;  %v1036_v63 = vmax.f32 %v1034_v47, %v1035_v39  ;;  %v1042_v0 = vrot.slane %v1041_v56, 1  ;;  %v1105_v1 = vpack.c.bf16 %v1022_v54, %v1022_v54  ;;  %v2093_v47 = vld [vmem:[#allocation8 + $0x40] sm:$0xff]  }
 0x313   :  { %v1049_v7 = vrot.slane %v1048_v58, 1  ;;  %v1055_v2 = vmax.f32 %v1053_v51, %v1054_v59  ;;  %v1063_v40 = vrot.slane %v1062_v60, 1  ;;  %v1069_v3 = vmax.f32 %v1067_v53, %v1068_v61  ;;  %v2095_v51 = vld [vmem:[#allocation8 + $0x50] sm:$0xff]   ;;  %v2096_v53 = vld [vmem:[#allocation8 + $0x58] sm:$0xff]   ;;  %v2097_v39 = vld [vmem:[#allocation10] sm:$0xff]  }
 0x314   :  { %v1043_v5 = vmax.f32 %v1041_v56, %v1042_v0  ;;  %v1084_v6 = vsel %vm675_vm10, %v1029_v62, %v1022_v54  ;;  %v1106_v9 = vpack.c.bf16 %v1029_v62, %v1029_v62  ;;  %v1107_v31 = vpack.c.bf16 %v1036_v63, %v1036_v63  ;;  %v2098_v56 = vld [vmem:[#allocation10 + $0x40] sm:$0xff]   ;;  %v2101_v59 = vld [vmem:[#allocation10 + $0x10] sm:$0xff]   ;;  %v2103_v61 = vld [vmem:[#allocation10 + $0x18] sm:$0xff]  }
 0x315   :  { %v1085_v32 = vsel %vm677_vm11, %v1036_v63, %v1084_v6  ;;  %v1130_v10 = vunpack.c.l.b16 %v1105_v1  ;;  %v1050_v11 = vmax.f32 %v1048_v58, %v1049_v7  ;;  %v1056_v13 = vrot.slane %v1055_v2, 1  ;;  %v2100_v58 = vld [vmem:[#allocation10 + $0x48] sm:$0xff]   ;;  %v2104_v62 = vld [vmem:[#allocation10 + $0x58] sm:$0xff]   ;;  %v2105_v63 = vld [vmem:[#allocation10 + $0x20] sm:$0xff]  }
 0x316   :  { %v1108_v14 = vpack.c.bf16 %v1043_v5, %v1043_v5  ;;  %v1131_v45 = vunpack.c.l.b16 %v1106_v9  ;;  %v1132_v46 = vunpack.c.l.b16 %v1107_v31  ;;  %v1064_v15 = vmax.f32 %v1062_v60, %v1063_v40  ;;  %v2102_v60 = vld [vmem:[#allocation10 + $0x50] sm:$0xff]   ;;  %v2106_v0 = vld [vmem:[#allocation10 + $0x60] sm:$0xff]   ;;  %v2107_v1 = vld [vmem:[#allocation10 + $0x28] sm:$0xff]  }
 0x317   :  { %v1057_v16 = vmax.f32 %v1055_v2, %v1056_v13  ;;  %v1070_v17 = vrot.slane %v1069_v3, 1  ;;  %v1086_v18 = vsel %vm679_vm12, %v1043_v5, %v1085_v32  ;;  %v1109_v19 = vpack.c.bf16 %v1050_v11, %v1050_v11  ;;  %v2108_v7 = vld [vmem:[#allocation10 + $0x68] sm:$0xff]   ;;  %v2109_v2 = vld [vmem:[#allocation10 + $0x30] sm:$0xff]   ;;  %v2112_v5 = vld [vmem:[#allocation10 + $0x78] sm:$0xff]  }
 0x318   :  { %v1133_v20 = vunpack.c.l.b16 %v1108_v14  ;;  %v1138_v21 = vsel %vm675_vm10, %v1131_v45, %v1130_v10  ;;  %v1087_v22 = vsel %vm681_vm13, %v1050_v11, %v1086_v18  ;;  %v1111_v23 = vpack.c.bf16 %v1064_v15, %v1064_v15  ;;  %v2110_v40 = vld [vmem:[#allocation10 + $0x70] sm:$0xff]  }
 0x319   :  { %v1139_v24 = vsel %vm677_vm11, %v1132_v46, %v1138_v21  ;;  %v1071_v25 = vmax.f32 %v1069_v3, %v1070_v17  ;;  %v1088_v26 = vsel %vm683_vm14, %v1057_v16, %v1087_v22  ;;  %v1110_v28 = vpack.c.bf16 %v1057_v16, %v1057_v16  ;;  %v2111_v3 = vld [vmem:[#allocation10 + $0x38] sm:$0xff]  }
 0x31a   :  { %v1134_v29 = vunpack.c.l.b16 %v1109_v19  ;;  %v1089_v30 = vsel %vm685_vm15, %v1064_v15, %v1088_v26  ;;  %v1140_v33 = vsel %vm679_vm12, %v1133_v20, %v1139_v24  ;;  %v1136_v37 = vunpack.c.l.b16 %v1111_v23  ;;  %vm1075_vm12 = vmor %vm1072_vm3, %vm651_vm7  ;;  %v1817_v15 = vld [vmem:[%s2731_s6] ss:$0 sm:$0xff] }
 0x31b   :  { %v1135_v34 = vunpack.c.l.b16 %v1110_v28  ;;  %v1090_v35 = vsel %vm687_vm2, %v1071_v25, %v1089_v30  ;;  %v1112_v36 = vpack.c.bf16 %v1071_v25, %v1071_v25  ;;  %vm1170_vm11 = vcmask 523264  }
 0x31c   :  { %v1092_v38 = vrot.slane %v1090_v35, 7  ;;  %v1141_v41 = vsel %vm681_vm13, %v1134_v29, %v1140_v33  ;;  %v1094_v52 = vrot.slane %v1090_v35, 1 }
 0x31d   :  { %v1137_v27 = vunpack.c.l.b16 %v1112_v36  ;;  %v1142_v42 = vsel %vm683_vm14, %v1135_v34, %v1141_v41 }
 0x31e   :  { %v1093_v43 = vsel %vm1074_vm6, 0.0, %v1092_v38  ;;  %v1143_v44 = vsel %vm685_vm15, %v1136_v37, %v1142_v42  ;;  %v1095_v54 = vsel %vm1075_vm12, 0.0, %v1094_v52 }
 0x31f   :  { %v1096_v4 = vpack.c.bf16 %v1093_v43, %v1093_v43  ;;  %v1144_v12 = vsel %vm687_vm2, %v1137_v27, %v1143_v44  ;;  %v1281_v55 = vpack.c.bf16 %v1095_v54, %v1095_v54 }
 0x320   :  { %v1145_v49 = vpack.c.b16 %v1144_v12, %v1144_v12 }
 0x321   :  { %1967 = vmatmul.mubr.msk.bf16.vlgmr.msra.gmra.mrb[8].mxu1 %vm1170_vm11, %v1096_v4 }
 0x322   :  { %1955 = vmatmul.mubr.msk.bf16.vlgmr.msra.gmra.mrb[8].mxu0 %vm1170_vm11, %v1145_v49  ;;  %1998 = vmatprep.mubr.msk.bf16.mxu1 %vm2296_vm8, %v2295_v48 }
 0x323   :  { %1971 = vmatpush3.bf16.msra.mxu0 %v2093_v47  ;;  %1978 = vmatprep.mubr.msk.bf16.mxu0 %vm2296_vm8, %v2295_v48 }
 0x324   :  { %1972 = vmatprep.subr.bf16.mxu0 %v2295_v48  ;;  %1983 = vmatpush3.bf16.msra.mxu1 %v2098_v56 }
 0x325   :  { %1984 = vmatprep.subr.bf16.mxu1 %v2295_v48 }
 0x327   :  { %1973 = vmatpush3.bf16.msra.mxu0 %v2094_v50 }
 0x328   :  { %1974 = vmatprep.subr.bf16.mxu0 %v2295_v48  ;;  %1985 = vmatpush3.bf16.msra.mxu1 %v2100_v58 }
 0x329   :  { %1986 = vmatprep.subr.bf16.mxu1 %v2295_v48 }
 0x32b   :  { %1975 = vmatpush3.bf16.msra.mxu0 %v2095_v51 }
 0x32c   :  { %1976 = vmatprep.subr.bf16.mxu0 %v2295_v48  ;;  %1987 = vmatpush3.bf16.msra.mxu1 %v2102_v60 }
 0x32d   :  { %1988 = vmatprep.subr.bf16.mxu1 %v2295_v48 }
 0x32f   :  { %1977 = vmatpush3.bf16.msra.mxu0 %v2096_v53 }
 0x330   :  { %2002 = vmatprep.subr.bf16.mxu0 %v2295_v48  ;;  %1989 = vmatpush3.bf16.msra.mxu1 %v2104_v62 }
 0x331   :  { %1990 = vmatprep.subr.bf16.mxu1 %v2295_v48 }
 0x332   :  { %1979 = vmatmul.mubr.msk.bf16.vlgmr.msra.gmra.mrb[12].mxu0 %vm1170_vm11, %v1281_v55 }
 0x333   :  { %2018 = vmatprep.mubr.msk.bf16.mxu0 %vm2296_vm8, %v2295_v48  ;;  %2003 = vmatpush3.bf16.msra.mxu0 %v2097_v39 }
 0x334   :  { %2004 = vmatprep.subr.bf16.mxu0 %v2295_v48  ;;  %1991 = vmatpush3.bf16.msra.mxu1 %v2106_v0 }
 0x335   :  { %1992 = vmatprep.subr.bf16.mxu1 %v2295_v48 }
 0x337   :  { %2005 = vmatpush3.bf16.msra.mxu0 %v2099_v8 }
 0x338   :  { %2006 = vmatprep.subr.bf16.mxu0 %v2295_v48  ;;  %1993 = vmatpush3.bf16.msra.mxu1 %v2108_v7 }
 0x339   :  { %1994 = vmatprep.subr.bf16.mxu1 %v2295_v48 }
 0x33b   :  { %2007 = vmatpush3.bf16.msra.mxu0 %v2101_v59 }
 0x33c   :  { %2008 = vmatprep.subr.bf16.mxu0 %v2295_v48  ;;  %1995 = vmatpush3.bf16.msra.mxu1 %v2110_v40 }
 0x33d   :  { %1996 = vmatprep.subr.bf16.mxu1 %v2295_v48 }
 0x33f   :  { %2009 = vmatpush3.bf16.msra.mxu0 %v2103_v61 }
 0x340   :  { %2010 = vmatprep.subr.bf16.mxu0 %v2295_v48  ;;  %1997 = vmatpush3.bf16.msra.mxu1 %v2112_v5 }
 0x341   :  { %2022 = vmatprep.subr.bf16.mxu1 %v2295_v48 }
 0x343   :  { %2011 = vmatpush3.bf16.msra.mxu0 %v2105_v63 }
 0x344   :  { %2012 = vmatprep.subr.bf16.mxu0 %v2295_v48 }
 0x347   :  { %2013 = vmatpush3.bf16.msra.mxu0 %v2107_v1 }
 0x348   :  { %2014 = vmatprep.subr.bf16.mxu0 %v2295_v48 }
 0x34b   :  { %2015 = vmatpush3.bf16.msra.mxu0 %v2109_v2 }
 0x34c   :  { %2016 = vmatprep.subr.bf16.mxu0 %v2295_v48 }
 0x34f   :  { %2017 = vmatpush3.bf16.msra.mxu0 %v2111_v3  ;;  %v2113_v3 = vld [vmem:[#allocation11] sm:$0xff]  }
 0x3f4   :  { %v1275_v6 = vpop.f32.mrb[8].mxu1 }
 0x3f5   :  { %v1208_v9 = vpop.f32.mrb[8].mxu0  ;;  %v1968_v31 = vpop.f32.mrb[9].mxu1 }
 0x3f6   :  { %v1276_v32 = vadd.f32 %v1275_v6, %v1208_v9  ;;  %v1956_v10 = vpop.f32.mrb[9].mxu0  ;;  %v1278_v11 = vpop.f32.mrb[10].mxu1  ;;  %v2114_v6 = vld [vmem:[#allocation11 + $0x8] sm:$0xff]   ;;  %v2115_v9 = vld [vmem:[#allocation11 + $0x10] sm:$0xff]   ;;  %v2116_v31 = vld [vmem:[#allocation11 + $0x18] sm:$0xff]  }
 0x3f7   :  { %v1211_v13 = vpop.f32.mrb[10].mxu0  ;;  %v1969_v14 = vpop.f32.mrb[11].mxu1  ;;  %v2118_v10 = vld [vmem:[#allocation11 + $0x28] sm:$0xff]   ;;  %v2119_v11 = vld [vmem:[#allocation11 + $0x30] sm:$0xff]  }
 0x3f8   :  { %v1957_v45 = vpop.f32.mrb[11].mxu0  ;;  %v2120_v13 = vld [vmem:[#allocation11 + $0x38] sm:$0xff]  }
 0x405   :  { %v1352_v46 = vpop.f32.mrb[12].mxu0 }
 0x406   :  { %v1358_v16 = vadd.f32 %v1352_v46, %v1276_v32  ;;  %v1980_v17 = vpop.f32.mrb[13].mxu0  ;;  %v2117_v32 = vld [vmem:[#allocation11 + $0x20] sm:$0xff]  }
 0x407   :  { %v1355_v18 = vpop.f32.mrb[14].mxu0 }
 0x408   :  { %v1366_v19 = vadd.f32 %v1817_v15, %v1358_v16  ;;  %v1981_v20 = vpop.f32.mrb[15].mxu0  ;;  %v1834_v15 = vld [vmem:[%s2733_s8] ss:$0 sm:$0xff]  ;;  %s2253_s8 = scalar_lea.vmem %s1774_s13, 32 }
 0x409   :  { %p2254_p6 = scmp.ne.s32.totalorder %s1774_s13, %s2253_s8  ;;  %p2259_p8 = scmp.lt.s32.totalorder %s2253_s8, %s2253_s8 }
 0x40a   :  { %v1367_v21 = vmax.f32 %v1366_v19, 0.0 }
 0x40b   :  { %p2260_p9 = por %p2259_p8, %p2258_p7 }
 0x40c   :  { %v1369_v22 = vcombine.high %v1367_v21, %v1367_v21  ;;  %v1376_v23 = vrot.slane %v1367_v21, %v2503_v57 }
 0x40d   :  { %p2261_p10 = pnand %p2260_p9, %p2254_p6 }
 0x40e   :  { %v1383_v24 = vrot.slane %v1369_v22, %v2503_v57  ;;  %v1384_v25 = vcombine.high %v1376_v23, %v1376_v23  ;;  %v1390_v26 = vsel %vm258_vm0, %v1376_v23, -inf }
 0x40f   :  { %v1391_v28 = vrot.slane %v1390_v26, 4 }
 0x410   :  { %v1385_v29 = vcombine.high %v1383_v24, %v1383_v24  ;;  %v1397_v30 = vsel %vm258_vm0, %v1384_v25, -inf  ;;  %v1404_v33 = vsel %vm258_vm0, %v1383_v24, -inf }
 0x411   :  { %v1392_v34 = vmax.f32 %v1390_v26, %v1391_v28  ;;  %v1398_v35 = vrot.slane %v1397_v30, 4  ;;  %v1405_v36 = vrot.slane %v1404_v33, 4 }
 0x412   :  { %v1411_v37 = vsel %vm258_vm0, %v1385_v29, -inf }
 0x413   :  { %v1393_v38 = vrot.slane %v1392_v34, 2  ;;  %v1399_v41 = vmax.f32 %v1397_v30, %v1398_v35  ;;  %v1406_v27 = vmax.f32 %v1404_v33, %v1405_v36  ;;  %v1412_v42 = vrot.slane %v1411_v37, 4 }
 0x415   :  { %v1394_v43 = vmax.f32 %v1392_v34, %v1393_v38  ;;  %v1400_v57 = vrot.slane %v1399_v41, 2  ;;  %v1407_v44 = vrot.slane %v1406_v27, 2  ;;  %v1413_v4 = vmax.f32 %v1411_v37, %v1412_v42 }
 0x417   :  { %v1395_v12 = vrot.slane %v1394_v43, 1  ;;  %v1401_v47 = vmax.f32 %v1399_v41, %v1400_v57  ;;  %v1408_v49 = vmax.f32 %v1406_v27, %v1407_v44  ;;  %v1414_v50 = vrot.slane %v1413_v4, 2 }
 0x419   :  { %v1396_v51 = vmax.f32 %v1394_v43, %v1395_v12  ;;  %v1402_v52 = vrot.slane %v1401_v47, 1  ;;  %v1409_v53 = vrot.slane %v1408_v49, 1  ;;  %v1415_v54 = vmax.f32 %v1413_v4, %v1414_v50 }
 0x41b   :  { %v1418_v55 = vpack.c.bf16 %v1396_v51, %v1396_v51  ;;  %v1410_v39 = vmax.f32 %v1408_v49, %v1409_v53  ;;  %v1403_v56 = vmax.f32 %v1401_v47, %v1402_v52  ;;  %v1416_v8 = vrot.slane %v1415_v54, 1 }
 0x41d   :  { %v1419_v58 = vpack.c.bf16 %v1410_v39, %v1410_v39  ;;  %v1417_v59 = vmax.f32 %v1415_v54, %v1416_v8  ;;  %v1436_v60 = vpack.c.bf16 %v1403_v56, %v1403_v56  ;;  %v1552_v61 = vunpack.c.l.b16 %v1418_v55 }
 0x41f   :  { %v1553_v62 = vunpack.c.l.b16 %v1419_v58  ;;  %v1437_v63 = vpack.c.bf16 %v1417_v59, %v1417_v59  ;;  %v1457_v1 = vunpack.c.l.b16 %v1436_v60 }
 0x421   :  { %v1554_v0 = vsel %vm675_vm10, %v1553_v62, %v1552_v61  ;;  %v1458_v7 = vunpack.c.l.b16 %v1437_v63 }
 0x422   :  { %v1555_v2 = vpack.c.b16 %v1554_v0, %v1554_v0 }
 0x423   :  { %v1459_v40 = vsel %vm675_vm10, %v1458_v7, %v1457_v1 }
 0x424   :  { %2019 = vmatmul.mubr.bf16.vlgmr.msra.gmra.mrb[16].mxu0 %v1555_v2  ;;  %v1460_v5 = vpack.c.b16 %v1459_v40, %v1459_v40 }
 0x426   :  { %1999 = vmatmul.mubr.bf16.vlgmr.msra.gmra.mrb[12].mxu1 %v1460_v5 }
 0x427   :  { %2023 = vmatpush3.bf16.msra.mxu1 %v2113_v3  ;;  %2038 = vmatprep.mubr.msk.bf16.mxu1 %vm2296_vm8, %v2295_v48 }
 0x428   :  { %2024 = vmatprep.subr.bf16.mxu1 %v2295_v48 }
 0x42b   :  { %2025 = vmatpush3.bf16.msra.mxu1 %v2114_v6 }
 0x42c   :  { %2026 = vmatprep.subr.bf16.mxu1 %v2295_v48 }
 0x42f   :  { %2027 = vmatpush3.bf16.msra.mxu1 %v2115_v9 }
 0x430   :  { %2028 = vmatprep.subr.bf16.mxu1 %v2295_v48 }
 0x433   :  { %2029 = vmatpush3.bf16.msra.mxu1 %v2116_v31 }
 0x434   :  { %2030 = vmatprep.subr.bf16.mxu1 %v2295_v48 }
 0x437   :  { %2031 = vmatpush3.bf16.msra.mxu1 %v2117_v32 }
 0x438   :  { %2032 = vmatprep.subr.bf16.mxu1 %v2295_v48 }
 0x43b   :  { %2033 = vmatpush3.bf16.msra.mxu1 %v2118_v10 }
 0x43c   :  { %2034 = vmatprep.subr.bf16.mxu1 %v2295_v48 }
 0x43f   :  { %2035 = vmatpush3.bf16.msra.mxu1 %v2119_v11 }
 0x440   :  { %2036 = vmatprep.subr.bf16.mxu1 %v2295_v48  ;;  %v1835_v48 = vld [vmem:[%s2735_s10] ss:$0 sm:$0xff] }
 0x443   :  { %2037 = vmatpush3.bf16.msra.mxu1 %v2120_v13 }
 0x4f7   :  { %v1639_v14 = vpop.f32.mrb[16].mxu0 }
 0x4f8   :  { %v2020_v45 = vpop.f32.mrb[17].mxu0 }
 0x4f9   :  { %v1544_v46 = vpop.f32.mrb[12].mxu1  ;;  %v1642_v16 = vpop.f32.mrb[18].mxu0 }
 0x4fa   :  { %v1640_v17 = vadd.f32 %v1639_v14, %v1544_v46  ;;  %v2000_v18 = vpop.f32.mrb[13].mxu1  ;;  %v2021_v19 = vpop.f32.mrb[19].mxu0 }
 0x4fb   :  { %v1547_v20 = vpop.f32.mrb[14].mxu1 }
 0x4fc   :  { %v1652_v21 = vadd.f32 %v1834_v15, %v1640_v17  ;;  %v2001_v22 = vpop.f32.mrb[15].mxu1 }
 0x4fe   :  { %v1653_v23 = vmax.f32 %v1652_v21, 0.0 }
 0x500   :  { %v1654_v24 = vpack.c.bf16 %v1653_v23, %v1653_v23 }
 0x502   :  { %2039 = vmatmul.mubr.bf16.vlgmr.msra.gmra.mrb[16].mxu1 %v1654_v24 }
 0x5d5   :  { %v1760_v25 = vpop.f32.mrb[16].mxu1 }
 0x5d6   :  { %v1761_v26 = vadd.f32 %v1835_v48, %v1760_v25  ;;  %v2040_v28 = vpop.f32.mrb[17].mxu1 }
 0x5d7   :  { %v1763_v29 = vpop.f32.mrb[18].mxu1 }
 0x5d8   :  { %1766 = vst [vmem:[#allocation13] sm:$0x3] %v1761_v26  ;;  %v2041_v30 = vpop.f32.mrb[19].mxu1 }
 0x5d9   :  { %2264 = shalt.err (!%p2261_p10)
}
 0x5da   :  { %s2265_s10 = scalar_lea.hbm %s2736_s11, 32 }
 0x5db   :  { %p2266_p11 = scmp.ne.s32.totalorder %s2736_s11, %s2265_s10  ;;  %p2269_p12 = scmp.lt.u32.totalorder %s2265_s10, %s2736_s11 }
 0x5dd   :  { %p2271_p13 = pnand %p2269_p12, %p2266_p11 }
 0x5df   :  { %2274 = shalt.err (!%p2271_p13)
}
 0x5e0   :  { %1776 = dma.vmem_to_hbm [thread:$0]  %s1774_s13, 32, %s2736_s11, [#allocation4]  }
 0x5e1   :  { %2283 = dma.done.wait [#allocation4], 32  }
 0x5e2   :  { %2284 = vsyncadd [#allocation4], 4294967264 }
 0x5e3   :  { %1780 = vsyncpa [#allocation3], 1 }
 0x5e4   :  { %1781 = vsyncpa [#allocation6], 1 }
 0x5e5   :  { %1782 = vsyncpa [#allocation9], 1 }
 0x5e6   :  { %1783 = vsyncpa [#allocation12], 1 }
 0x5e7   :  { %1784 = vsyncpa [#allocation4], 1 }

</bundles_post_ra>
